<compile_context>
chip_gen: v5e
topology: v5e:2x2
jax: 0.10.0
libtpu: 0.0.40
codegen_flags: <defaults>
</compile_context>

<pallas_src>
import functools

import jax
import jax.numpy as jnp
from jax.experimental import pallas as pl
from jax.experimental.pallas import tpu as pltpu


def _round_up(x, m):
    return (x + m - 1) // m * m


# ---------------------------------------------------------------------------
# Patch embedding kernel: non-overlapping Conv2d == matmul over unfolded patches
# ---------------------------------------------------------------------------
def _patch_embed_kernel(xp_ref, w_ref, b_ref, o_ref):
    o_ref[...] = (
        jnp.dot(xp_ref[...], w_ref[...], preferred_element_type=jnp.float32)
        + b_ref[...]
    )


def patch_embed(xp, w, b):
    """xp: (N, K) unfolded patches, w: (K, E), b: (1, E) -> (N, E) f32."""
    n, k = xp.shape
    e = w.shape[1]

    # Row tiling: standard double-buffered pipeline + megacore-parallel row axis.
    tile_n = min(256, _round_up(n, 8))
    n_pad = _round_up(n, tile_n)
    if n_pad != n:
        xp = jnp.pad(xp, ((0, n_pad - n), (0, 0)))

    out = pl.pallas_call(
        _patch_embed_kernel,
        grid=(n_pad // tile_n,),
        out_shape=jax.ShapeDtypeStruct((n_pad, e), jnp.float32),
        in_specs=[
            pl.BlockSpec((tile_n, k), lambda i: (i, 0)),
            pl.BlockSpec((k, e), lambda i: (0, 0)),
            pl.BlockSpec((1, e), lambda i: (0, 0)),
        ],
        out_specs=pl.BlockSpec((tile_n, e), lambda i: (i, 0)),
        compiler_params=pltpu.CompilerParams(
            dimension_semantics=("parallel",),
            vmem_limit_bytes=48 * 1024 * 1024,
        ),
    )(xp.astype(jnp.bfloat16), w.astype(jnp.bfloat16), b.astype(jnp.float32))
    return out[:n]


# ---------------------------------------------------------------------------
# Fused TransformerEncoder stack kernel (post-norm, ReLU, all layers in one call)
# ---------------------------------------------------------------------------
def _layer_norm(x, gamma, beta, eps=1e-5):
    mean = jnp.mean(x, axis=-1, keepdims=True)
    var = jnp.mean((x - mean) ** 2, axis=-1, keepdims=True)
    return (x - mean) * jax.lax.rsqrt(var + eps) * gamma + beta


def _encoder_stack_kernel(num_heads, s_real,
                          x_ref, wqkv_ref, bqkv_ref, wo_ref, bo_ref,
                          ln1g_ref, ln1b_ref,
                          w1_ref, b1_ref, w2_ref, b2_ref,
                          ln2g_ref, ln2b_ref,
                          o_ref):
    d = pl.program_id(1)

    # Residual stream lives in the (resident) output block across the depth axis.
    @pl.when(d == 0)
    def _():
        o_ref[...] = x_ref[...]

    Bt, S, E = o_ref.shape
    H = num_heads
    hd = E // H
    scale = 1.0 / (hd ** 0.5)

    x = o_ref[...]                                   # (Bt, S, E) f32
    xf = x.reshape(Bt * S, E)

    # --- QKV projection: flatten batch*seq rows, bf16 MXU inputs, f32 accumulate ---
    qkv = jnp.dot(xf.astype(jnp.bfloat16), wqkv_ref[0],
                  preferred_element_type=jnp.float32) + bqkv_ref[0]   # (Bt*S, 3E) f32

    def split_heads(t):                               # (Bt*S, E) -> (Bt*H, S, hd)
        t = t.reshape(Bt, S, H, hd)
        t = jnp.transpose(t, (0, 2, 1, 3))
        return t.reshape(Bt * H, S, hd)

    q = split_heads(qkv[:, 0 * E:1 * E])
    k = split_heads(qkv[:, 1 * E:2 * E])
    v = split_heads(qkv[:, 2 * E:3 * E])

    # --- scaled dot-product attention, all heads batched in one einsum ---
    logits = jnp.einsum('bqd,bkd->bqk',
                        q.astype(jnp.bfloat16), k.astype(jnp.bfloat16),
                        preferred_element_type=jnp.float32) * scale    # (Bt*H, S, S)
    if s_real < S:
        # mask padded key columns (pad query rows are discarded by the wrapper)
        kidx = jax.lax.broadcasted_iota(jnp.int32, (1, S), 1).reshape(1, 1, S)
        logits = jnp.where(kidx < s_real, logits, -1e30)
    logits = logits - jnp.max(logits, axis=-1, keepdims=True)
    p = jnp.exp(logits)
    p = p * pl.reciprocal(jnp.sum(p, axis=-1, keepdims=True), approx=True)

    ctx = jnp.einsum('bqk,bkd->bqd',
                     p.astype(jnp.bfloat16), v.astype(jnp.bfloat16),
                     preferred_element_type=jnp.float32)               # (Bt*H, S, hd)
    ctx = jnp.transpose(ctx.reshape(Bt, H, S, hd), (0, 2, 1, 3)).reshape(Bt * S, E)

    attn = jnp.dot(ctx.astype(jnp.bfloat16), wo_ref[0],
                   preferred_element_type=jnp.float32) + bo_ref[0]

    # --- residual + LayerNorm 1 (f32) ---
    y = _layer_norm(xf + attn, ln1g_ref[0], ln1b_ref[0])

    # --- feed-forward (ReLU), bf16 matmul inputs ---
    h1 = jnp.dot(y.astype(jnp.bfloat16), w1_ref[0],
                 preferred_element_type=jnp.float32) + b1_ref[0]
    h1 = jnp.maximum(h1, 0.0)
    h2 = jnp.dot(h1.astype(jnp.bfloat16), w2_ref[0],
                 preferred_element_type=jnp.float32) + b2_ref[0]

    # --- residual + LayerNorm 2 (f32), write back the resident residual stream ---
    o_ref[...] = _layer_norm(y + h2, ln2g_ref[0], ln2b_ref[0]).reshape(Bt, S, E)


def _pick_block_b(batch, seq):
    """Batch elements per grid step: ~256 flattened rows, but keep >=2 grid steps
    on the parallel axis when possible (v7x has 2 TensorCores)."""
    if batch <= 1:
        return 1
    target = max(1, 256 // seq)
    best = 1
    for cand in range(1, batch // 2 + 1):
        if batch % cand == 0 and cand <= target:
            best = cand
    return best


def transformer_encoder(tokens, stacked, num_heads, s_real):
    """tokens: (B, S_pad, E) f32; stacked: dict of (depth, ...) weight arrays."""
    B, S, E = tokens.shape
    depth = stacked["wqkv"].shape[0]
    M = stacked["w1"].shape[2]
    Bt = _pick_block_b(B, S)
    nb = B // Bt

    kernel = functools.partial(_encoder_stack_kernel, num_heads, s_real)

    def wspec(shape):
        # per-layer weight block: index only depends on the depth grid axis, so the
        # next layer's weights are prefetched (double-buffered) under current compute.
        return pl.BlockSpec((1,) + shape, lambda b, d, _s=shape: (d,) + (0,) * len(_s))

    in_specs = [
        pl.BlockSpec((Bt, S, E), lambda b, d: (b, 0, 0)),   # tokens (per-batch-tile block)
        wspec((E, 3 * E)), wspec((1, 3 * E)),               # qkv proj
        wspec((E, E)), wspec((1, E)),                       # out proj
        wspec((1, E)), wspec((1, E)),                       # ln1
        wspec((E, M)), wspec((1, M)),                       # ff linear1
        wspec((M, E)), wspec((1, E)),                       # ff linear2
        wspec((1, E)), wspec((1, E)),                       # ln2
    ]
    # TODO(synk): for ViT-Base-scale shapes on v7x (64 MiB VMEM), additionally K-tile
    #             w1/w2 along mlp_dim; not needed at these small demo shapes.
    return pl.pallas_call(
        kernel,
        grid=(nb, depth),
        out_shape=jax.ShapeDtypeStruct((B, S, E), jnp.float32),
        in_specs=in_specs,
        out_specs=pl.BlockSpec((Bt, S, E), lambda b, d: (b, 0, 0)),
        compiler_params=pltpu.CompilerParams(
            dimension_semantics=("parallel", "arbitrary"),
            vmem_limit_bytes=48 * 1024 * 1024,
        ),
    )(tokens,
      stacked["wqkv"], stacked["bqkv"], stacked["wo"], stacked["bo"],
      stacked["ln1_g"], stacked["ln1_b"],
      stacked["w1"], stacked["b1"], stacked["w2"], stacked["b2"],
      stacked["ln2_g"], stacked["ln2_b"])


# ---------------------------------------------------------------------------
# Parameter init (deterministic, shapes per the PyTorch __init__)
# ---------------------------------------------------------------------------
def init_params(key, image_size, patch_size, in_channels, embed_dim, depth,
                num_heads, mlp_dim):
    num_patches = (image_size // patch_size) ** 2
    keys = jax.random.split(key, 2 + depth)

    kconv = 1.0 / (in_channels * patch_size * patch_size) ** 0.5
    conv_w = jax.random.uniform(
        keys[0], (embed_dim, in_channels, patch_size, patch_size),
        jnp.float32, -kconv, kconv)
    conv_b = jax.random.uniform(keys[1], (embed_dim,), jnp.float32, -kconv, kconv)

    # cls_token / pos_embed are torch.zeros in the module __init__
    cls_token = jnp.zeros((1, 1, embed_dim), jnp.float32)
    pos_embed = jnp.zeros((1, 1 + num_patches, embed_dim), jnp.float32)

    kE = 1.0 / embed_dim ** 0.5
    kM = 1.0 / mlp_dim ** 0.5
    layers = []
    for d in range(depth):
        lk = jax.random.split(keys[2 + d], 7)
        layers.append(dict(
            wqkv=jax.random.uniform(lk[0], (embed_dim, 3 * embed_dim), jnp.float32, -kE, kE),
            bqkv=jnp.zeros((1, 3 * embed_dim), jnp.float32),
            wo=jax.random.uniform(lk[1], (embed_dim, embed_dim), jnp.float32, -kE, kE),
            bo=jax.random.uniform(lk[2], (1, embed_dim), jnp.float32, -kE, kE),
            ln1_g=jnp.ones((1, embed_dim), jnp.float32),
            ln1_b=jnp.zeros((1, embed_dim), jnp.float32),
            w1=jax.random.uniform(lk[3], (embed_dim, mlp_dim), jnp.float32, -kE, kE),
            b1=jax.random.uniform(lk[4], (1, mlp_dim), jnp.float32, -kE, kE),
            w2=jax.random.uniform(lk[5], (mlp_dim, embed_dim), jnp.float32, -kM, kM),
            b2=jax.random.uniform(lk[6], (1, embed_dim), jnp.float32, -kM, kM),
            ln2_g=jnp.ones((1, embed_dim), jnp.float32),
            ln2_b=jnp.zeros((1, embed_dim), jnp.float32),
        ))
    return dict(conv_w=conv_w, conv_b=conv_b,
                cls_token=cls_token, pos_embed=pos_embed, layers=layers)


def _stack_layer_params(layers):
    """Stack per-layer params to (depth, ...) arrays; matmul weights in bf16."""
    def stk(name, dtype):
        return jnp.stack([l[name] for l in layers]).astype(dtype)
    return dict(
        wqkv=stk("wqkv", jnp.bfloat16), bqkv=stk("bqkv", jnp.float32),
        wo=stk("wo", jnp.bfloat16), bo=stk("bo", jnp.float32),
        ln1_g=stk("ln1_g", jnp.float32), ln1_b=stk("ln1_b", jnp.float32),
        w1=stk("w1", jnp.bfloat16), b1=stk("b1", jnp.float32),
        w2=stk("w2", jnp.bfloat16), b2=stk("b2", jnp.float32),
        ln2_g=stk("ln2_g", jnp.float32), ln2_b=stk("ln2_b", jnp.float32),
    )


# ---------------------------------------------------------------------------
# Full forward pass
# ---------------------------------------------------------------------------
def vit_encoder_forward(x, params, patch_size, num_heads):
    B, C, H, W = x.shape
    ps = patch_size
    hp, wp = H // ps, W // ps
    P = hp * wp

    # Unfold NCHW into patch rows; order matches Conv2d(flatten(2).transpose(1,2)):
    # patches row-major over (h, w), per-patch elements in (c, kh, kw) order.
    xp = x.reshape(B, C, hp, ps, wp, ps)
    xp = jnp.transpose(xp, (0, 2, 4, 1, 3, 5)).reshape(B * P, C * ps * ps)
    w = params["conv_w"].reshape(params["conv_w"].shape[0], -1).T    # (C*ps*ps, E)
    b = params["conv_b"].reshape(1, -1)

    emb = patch_embed(xp, w, b)                    # (B*P, E) f32
    E = emb.shape[1]
    emb = emb.reshape(B, P, E)

    cls = jnp.broadcast_to(params["cls_token"], (B, 1, E))
    tokens = jnp.concatenate([cls, emb], axis=1) + params["pos_embed"]   # (B, S, E)

    # Pad sequence to a multiple of 8 (sublane alignment); pad keys are masked in-kernel.
    s_real = 1 + P
    s_pad = _round_up(s_real, 8)
    if s_pad != s_real:
        tokens = jnp.pad(tokens, ((0, 0), (0, s_pad - s_real), (0, 0)))

    # TODO(synk): dropout layers are identity here (eval-mode forward semantics).
    stacked = _stack_layer_params(params["layers"])
    tokens = transformer_encoder(tokens, stacked, num_heads, s_real)

    return tokens[:, 0]                            # CLS embedding (B, E)


if __name__ == "__main__":
    # Small shapes consistent with the module: image 16x16, patch 8 -> 4 patches, S=5 (padded to 8).
    image_size, patch_size, in_channels = 16, 8, 3
    embed_dim, depth, num_heads, mlp_dim = 32, 2, 4, 64
    batch = 2

    key = jax.random.PRNGKey(0)
    kx, kp = jax.random.split(key)
    x = jax.random.normal(kx, (batch, in_channels, image_size, image_size), jnp.float32)
    params = init_params(kp, image_size, patch_size, in_channels,
                         embed_dim, depth, num_heads, mlp_dim)

    forward = jax.jit(vit_encoder_forward, static_argnums=(2, 3))
    out = forward(x, params, patch_size, num_heads)
    out = jax.block_until_ready(out)
    assert out.shape == (batch, embed_dim), out.shape
    assert bool(jnp.all(jnp.isfinite(out)))
    print("KERNEL_OK")
</pallas_src>

<mosaic_0001>
module attributes {stable_mosaic.version = 11 : i64} {
  func.func @_patch_embed_kernel(%arg0: i32, %arg1: memref<8x192xbf16, #tpu.memory_space<vmem>>, %arg2: memref<192x32xbf16, #tpu.memory_space<vmem>>, %arg3: memref<1x32xf32, #tpu.memory_space<vmem>>, %arg4: memref<8x32xf32, #tpu.memory_space<vmem>>) attributes {dimension_semantics = [#tpu.dimension_semantics<parallel>], iteration_bounds = array<i64: 1>, scalar_prefetch = 0 : i64, scratch_operands = 0 : i64, tpu.core_type = #tpu.core_type<tc>, window_params = [{transform_indices = @transform_0, window_bounds = array<i64: 8, 192>}, {pipeline_mode = #tpu.pipeline_mode<synchronous>, transform_indices = @transform_1, window_bounds = array<i64: 192, 32>}, {pipeline_mode = #tpu.pipeline_mode<synchronous>, transform_indices = @transform_2, window_bounds = array<i64: 1, 32>}, {transform_indices = @transform_3, window_bounds = array<i64: 8, 32>}]} {
    %c0 = arith.constant 0 : index
    %c0_0 = arith.constant 0 : index
    %0 = vector.load %arg1[%c0, %c0_0] : memref<8x192xbf16, #tpu.memory_space<vmem>>, vector<8x192xbf16>
    %c0_1 = arith.constant 0 : index
    %c0_2 = arith.constant 0 : index
    %1 = vector.load %arg2[%c0_1, %c0_2] : memref<192x32xbf16, #tpu.memory_space<vmem>>, vector<192x32xbf16>
    %cst = arith.constant dense<0.000000e+00> : vector<8x32xf32>
    %2 = tpu.matmul %0, %1, %cst {dimension_numbers = #tpu.dot_dimension_numbers<[1], [0], [0], [1], [0, 0, 1, 1], [], []>} : vector<8x192xbf16>, vector<192x32xbf16>, vector<8x32xf32> -> vector<8x32xf32>
    %c0_3 = arith.constant 0 : index
    %c0_4 = arith.constant 0 : index
    %3 = vector.load %arg3[%c0_3, %c0_4] : memref<1x32xf32, #tpu.memory_space<vmem>>, vector<1x32xf32>
    %4 = vector.broadcast %3 : vector<1x32xf32> to vector<8x32xf32>
    %5 = arith.addf %2, %4 : vector<8x32xf32>
    %c0_5 = arith.constant 0 : index
    %c0_6 = arith.constant 0 : index
    %6 = vector.load %arg4[%c0_5, %c0_6] : memref<8x32xf32, #tpu.memory_space<vmem>>, vector<8x32xf32>
    tpu.vector_store %arg4[%c0_5, %c0_6], %5 {strides = array<i32>} : memref<8x32xf32, #tpu.memory_space<vmem>>, vector<8x32xf32>,
    return
  }
  func.func @transform_0(%arg0: i32) -> (i32, i32) {
    %c0_i32 = arith.constant 0 : i32
    %c0_i32_0 = arith.constant 0 : i32
    return %arg0, %c0_i32 : i32, i32
  }
  func.func @transform_1(%arg0: i32) -> (i32, i32) {
    %c0_i32 = arith.constant 0 : i32
    %c0_i32_0 = arith.constant 0 : i32
    %c0_i32_1 = arith.constant 0 : i32
    return %c0_i32, %c0_i32_0 : i32, i32
  }
  func.func @transform_2(%arg0: i32) -> (i32, i32) {
    %c0_i32 = arith.constant 0 : i32
    %c0_i32_0 = arith.constant 0 : i32
    %c0_i32_1 = arith.constant 0 : i32
    return %c0_i32, %c0_i32_0 : i32, i32
  }
  func.func @transform_3(%arg0: i32) -> (i32, i32) {
    %c0_i32 = arith.constant 0 : i32
    %c0_i32_0 = arith.constant 0 : i32
    return %arg0, %c0_i32 : i32, i32
  }
}

module attributes {stable_mosaic.version = 11 : i64} {
  func.func @_encoder_stack_kernel(%arg0: i32, %arg1: i32, %arg2: memref<1x8x32xf32, #tpu.memory_space<vmem>>, %arg3: memref<1x32x96xbf16, #tpu.memory_space<vmem>>, %arg4: memref<1x1x96xf32, #tpu.memory_space<vmem>>, %arg5: memref<1x32x32xbf16, #tpu.memory_space<vmem>>, %arg6: memref<1x1x32xf32, #tpu.memory_space<vmem>>, %arg7: memref<1x1x32xf32, #tpu.memory_space<vmem>>, %arg8: memref<1x1x32xf32, #tpu.memory_space<vmem>>, %arg9: memref<1x32x64xbf16, #tpu.memory_space<vmem>>, %arg10: memref<1x1x64xf32, #tpu.memory_space<vmem>>, %arg11: memref<1x64x32xbf16, #tpu.memory_space<vmem>>, %arg12: memref<1x1x32xf32, #tpu.memory_space<vmem>>, %arg13: memref<1x1x32xf32, #tpu.memory_space<vmem>>, %arg14: memref<1x1x32xf32, #tpu.memory_space<vmem>>, %arg15: memref<1x8x32xf32, #tpu.memory_space<vmem>>) attributes {dimension_semantics = [#tpu.dimension_semantics<parallel>, #tpu.dimension_semantics<arbitrary>], iteration_bounds = array<i64: 2, 2>, scalar_prefetch = 0 : i64, scratch_operands = 0 : i64, tpu.core_type = #tpu.core_type<tc>, window_params = [{transform_indices = @transform_0, window_bounds = array<i64: 1, 8, 32>}, {transform_indices = @transform_1, window_bounds = array<i64: 1, 32, 96>}, {transform_indices = @transform_2, window_bounds = array<i64: 1, 1, 96>}, {transform_indices = @transform_3, window_bounds = array<i64: 1, 32, 32>}, {transform_indices = @transform_4, window_bounds = array<i64: 1, 1, 32>}, {transform_indices = @transform_5, window_bounds = array<i64: 1, 1, 32>}, {transform_indices = @transform_6, window_bounds = array<i64: 1, 1, 32>}, {transform_indices = @transform_7, window_bounds = array<i64: 1, 32, 64>}, {transform_indices = @transform_8, window_bounds = array<i64: 1, 1, 64>}, {transform_indices = @transform_9, window_bounds = array<i64: 1, 64, 32>}, {transform_indices = @transform_10, window_bounds = array<i64: 1, 1, 32>}, {transform_indices = @transform_11, window_bounds = array<i64: 1, 1, 32>}, {transform_indices = @transform_12, window_bounds = array<i64: 1, 1, 32>}, {transform_indices = @transform_13, window_bounds = array<i64: 1, 8, 32>}]} {
    %c0_i32 = arith.constant 0 : i32
    %0 = arith.cmpi eq, %arg1, %c0_i32 : i32
    %1 = arith.extui %0 : i1 to i32
    %c0_i32_0 = arith.constant 0 : i32
    %2 = arith.cmpi ne, %1, %c0_i32_0 : i32
    scf.if %2 {
      %c0_62 = arith.constant 0 : index
      %c0_63 = arith.constant 0 : index
      %c0_64 = arith.constant 0 : index
      %136 = vector.load %arg2[%c0_62, %c0_63, %c0_64] : memref<1x8x32xf32, #tpu.memory_space<vmem>>, vector<1x8x32xf32>
      %c0_65 = arith.constant 0 : index
      %c0_66 = arith.constant 0 : index
      %c0_67 = arith.constant 0 : index
      %137 = vector.load %arg15[%c0_65, %c0_66, %c0_67] : memref<1x8x32xf32, #tpu.memory_space<vmem>>, vector<1x8x32xf32>
      tpu.vector_store %arg15[%c0_65, %c0_66, %c0_67], %136 {strides = array<i32>} : memref<1x8x32xf32, #tpu.memory_space<vmem>>, vector<1x8x32xf32>,
    } else {
    }
    %c0 = arith.constant 0 : index
    %c0_1 = arith.constant 0 : index
    %c0_2 = arith.constant 0 : index
    %3 = vector.load %arg15[%c0, %c0_1, %c0_2] : memref<1x8x32xf32, #tpu.memory_space<vmem>>, vector<1x8x32xf32>
    %4 = vector.shape_cast %3 : vector<1x8x32xf32> to vector<8x32xf32>
    %5 = arith.truncf %4 : vector<8x32xf32> to vector<8x32xbf16>
    %c0_3 = arith.constant 0 : index
    %c0_4 = arith.constant 0 : index
    %c0_5 = arith.constant 0 : index
    %6 = vector.load %arg3[%c0_3, %c0_4, %c0_5] : memref<1x32x96xbf16, #tpu.memory_space<vmem>>, vector<1x32x96xbf16>
    %7 = vector.shape_cast %6 : vector<1x32x96xbf16> to vector<32x96xbf16>
    %cst = arith.constant dense<0.000000e+00> : vector<8x96xf32>
    %8 = tpu.matmul %5, %7, %cst {dimension_numbers = #tpu.dot_dimension_numbers<[1], [0], [0], [1], [0, 0, 1, 1], [], []>} : vector<8x32xbf16>, vector<32x96xbf16>, vector<8x96xf32> -> vector<8x96xf32>
    %c0_6 = arith.constant 0 : index
    %c0_7 = arith.constant 0 : index
    %c0_8 = arith.constant 0 : index
    %9 = vector.load %arg4[%c0_6, %c0_7, %c0_8] : memref<1x1x96xf32, #tpu.memory_space<vmem>>, vector<1x1x96xf32>
    %10 = vector.shape_cast %9 : vector<1x1x96xf32> to vector<1x96xf32>
    %11 = vector.broadcast %10 : vector<1x96xf32> to vector<8x96xf32>
    %12 = arith.addf %8, %11 : vector<8x96xf32>
    %13 = vector.extract_strided_slice %12 {offsets = [0, 0], sizes = [8, 32], strides = [1, 1]} : vector<8x96xf32> to vector<8x32xf32>
    %14 = vector.shape_cast %13 : vector<8x32xf32> to vector<1x8x4x8xf32>
    %15 = tpu.transpose %14, [0, 2, 1, 3] : vector<1x8x4x8xf32> -> vector<1x4x8x8xf32>
    %16 = vector.shape_cast %15 : vector<1x4x8x8xf32> to vector<4x8x8xf32>
    %17 = vector.extract_strided_slice %12 {offsets = [0, 32], sizes = [8, 32], strides = [1, 1]} : vector<8x96xf32> to vector<8x32xf32>
    %18 = vector.shape_cast %17 : vector<8x32xf32> to vector<1x8x4x8xf32>
    %19 = tpu.transpose %18, [0, 2, 1, 3] : vector<1x8x4x8xf32> -> vector<1x4x8x8xf32>
    %20 = vector.shape_cast %19 : vector<1x4x8x8xf32> to vector<4x8x8xf32>
    %21 = vector.extract_strided_slice %12 {offsets = [0, 64], sizes = [8, 32], strides = [1, 1]} : vector<8x96xf32> to vector<8x32xf32>
    %22 = vector.shape_cast %21 : vector<8x32xf32> to vector<1x8x4x8xf32>
    %23 = tpu.transpose %22, [0, 2, 1, 3] : vector<1x8x4x8xf32> -> vector<1x4x8x8xf32>
    %24 = vector.shape_cast %23 : vector<1x4x8x8xf32> to vector<4x8x8xf32>
    %25 = arith.truncf %16 : vector<4x8x8xf32> to vector<4x8x8xbf16>
    %26 = arith.truncf %20 : vector<4x8x8xf32> to vector<4x8x8xbf16>
    "tpu.trace_start"() <{level = 10 : i32, message = "bqd,bkd->bqk"}> : () -> ()
    %cst_9 = arith.constant dense<0.000000e+00> : vector<4x8x8xf32>
    %27 = tpu.matmul %25, %26, %cst_9 {dimension_numbers = #tpu.dot_dimension_numbers<[2], [2], [1], [1], [0, 0, 0, 1, 1, 1], [0], [0]>} : vector<4x8x8xbf16>, vector<4x8x8xbf16>, vector<4x8x8xf32> -> vector<4x8x8xf32>
    "tpu.trace_stop"() : () -> ()
    %cst_10 = arith.constant 0.353553385 : f32
    %28 = vector.broadcast %cst_10 : f32 to vector<4x8x8xf32>
    %29 = arith.mulf %27, %28 : vector<4x8x8xf32>
    %30 = tpu.iota {dimensions = array<i32: 1>} : vector<1x8xi32>
    %31 = vector.shape_cast %30 : vector<1x8xi32> to vector<1x1x8xi32>
    %c5_i32 = arith.constant 5 : i32
    %32 = vector.broadcast %c5_i32 : i32 to vector<1x1x8xi32>
    %33 = arith.cmpi slt, %31, %32 : vector<1x1x8xi32>
    %cst_11 = arith.constant -1.000000e+30 : f32
    %34 = vector.shape_cast %33 : vector<1x1x8xi1> to vector<1x1x8xi1>
    %35 = vector.broadcast %34 : vector<1x1x8xi1> to vector<4x8x8xi1>
    %36 = vector.broadcast %cst_11 : f32 to vector<4x8x8xf32>
    %37 = arith.select %35, %29, %36 : vector<4x8x8xi1>, vector<4x8x8xf32>
    %cst_12 = arith.constant dense<0xFF800000> : vector<4x8xf32>
    %38 = vector.multi_reduction <maximumf>, %37, %cst_12 [2] : vector<4x8x8xf32> to vector<4x8xf32>
    %39 = vector.shape_cast %38 : vector<4x8xf32> to vector<4x8x1xf32>
    %40 = vector.broadcast %39 : vector<4x8x1xf32> to vector<4x8x8xf32>
    %41 = arith.subf %37, %40 : vector<4x8x8xf32>
    %42 = math.exp %41 : vector<4x8x8xf32>
    %cst_13 = arith.constant dense<0.000000e+00> : vector<4x8xf32>
    %43 = vector.multi_reduction <add>, %42, %cst_13 [2] : vector<4x8x8xf32> to vector<4x8xf32>
    %44 = vector.shape_cast %43 : vector<4x8xf32> to vector<4x8x1xf32>
    %45 = tpu.reciprocal %44 {approx = true} : vector<4x8x1xf32> -> vector<4x8x1xf32>
    %46 = vector.broadcast %45 : vector<4x8x1xf32> to vector<4x8x8xf32>
    %47 = arith.mulf %42, %46 : vector<4x8x8xf32>
    %48 = arith.truncf %47 : vector<4x8x8xf32> to vector<4x8x8xbf16>
    %49 = arith.truncf %24 : vector<4x8x8xf32> to vector<4x8x8xbf16>
    "tpu.trace_start"() <{level = 10 : i32, message = "bqk,bkd->bqd"}> : () -> ()
    %cst_14 = arith.constant dense<0.000000e+00> : vector<4x8x8xf32>
    %50 = tpu.matmul %48, %49, %cst_14 {dimension_numbers = #tpu.dot_dimension_numbers<[2], [1], [1], [2], [0, 0, 0, 1, 1, 2], [0], [0]>} : vector<4x8x8xbf16>, vector<4x8x8xbf16>, vector<4x8x8xf32> -> vector<4x8x8xf32>
    "tpu.trace_stop"() : () -> ()
    %51 = vector.shape_cast %50 : vector<4x8x8xf32> to vector<1x4x8x8xf32>
    %52 = tpu.transpose %51, [0, 2, 1, 3] : vector<1x4x8x8xf32> -> vector<1x8x4x8xf32>
    %53 = vector.shape_cast %52 : vector<1x8x4x8xf32> to vector<8x32xf32>
    %54 = arith.truncf %53 : vector<8x32xf32> to vector<8x32xbf16>
    %c0_15 = arith.constant 0 : index
    %c0_16 = arith.constant 0 : index
    %c0_17 = arith.constant 0 : index
    %55 = vector.load %arg5[%c0_15, %c0_16, %c0_17] : memref<1x32x32xbf16, #tpu.memory_space<vmem>>, vector<1x32x32xbf16>
    %56 = vector.shape_cast %55 : vector<1x32x32xbf16> to vector<32x32xbf16>
    %cst_18 = arith.constant dense<0.000000e+00> : vector<8x32xf32>
    %57 = tpu.matmul %54, %56, %cst_18 {dimension_numbers = #tpu.dot_dimension_numbers<[1], [0], [0], [1], [0, 0, 1, 1], [], []>} : vector<8x32xbf16>, vector<32x32xbf16>, vector<8x32xf32> -> vector<8x32xf32>
    %c0_19 = arith.constant 0 : index
    %c0_20 = arith.constant 0 : index
    %c0_21 = arith.constant 0 : index
    %58 = vector.load %arg6[%c0_19, %c0_20, %c0_21] : memref<1x1x32xf32, #tpu.memory_space<vmem>>, vector<1x1x32xf32>
    %59 = vector.shape_cast %58 : vector<1x1x32xf32> to vector<1x32xf32>
    %60 = vector.broadcast %59 : vector<1x32xf32> to vector<8x32xf32>
    %61 = arith.addf %57, %60 : vector<8x32xf32>
    %62 = arith.addf %4, %61 : vector<8x32xf32>
    %c0_22 = arith.constant 0 : index
    %c0_23 = arith.constant 0 : index
    %c0_24 = arith.constant 0 : index
    %63 = vector.load %arg7[%c0_22, %c0_23, %c0_24] : memref<1x1x32xf32, #tpu.memory_space<vmem>>, vector<1x1x32xf32>
    %64 = vector.shape_cast %63 : vector<1x1x32xf32> to vector<1x32xf32>
    %c0_25 = arith.constant 0 : index
    %c0_26 = arith.constant 0 : index
    %c0_27 = arith.constant 0 : index
    %65 = vector.load %arg8[%c0_25, %c0_26, %c0_27] : memref<1x1x32xf32, #tpu.memory_space<vmem>>, vector<1x1x32xf32>
    %66 = vector.shape_cast %65 : vector<1x1x32xf32> to vector<1x32xf32>
    %cst_28 = arith.constant dense<0.000000e+00> : vector<8xf32>
    %67 = vector.multi_reduction <add>, %62, %cst_28 [1] : vector<8x32xf32> to vector<8xf32>
    %68 = vector.shape_cast %67 : vector<8xf32> to vector<8x1xf32>
    %cst_29 = arith.constant 3.200000e+01 : f32
    %69 = vector.broadcast %cst_29 : f32 to vector<8x1xf32>
    %70 = arith.divf %68, %69 : vector<8x1xf32>
    %71 = vector.broadcast %70 : vector<8x1xf32> to vector<8x32xf32>
    %72 = arith.subf %62, %71 : vector<8x32xf32>
    %73 = arith.mulf %72, %72 : vector<8x32xf32>
    %cst_30 = arith.constant dense<0.000000e+00> : vector<8xf32>
    %74 = vector.multi_reduction <add>, %73, %cst_30 [1] : vector<8x32xf32> to vector<8xf32>
    %75 = vector.shape_cast %74 : vector<8xf32> to vector<8x1xf32>
    %cst_31 = arith.constant 3.200000e+01 : f32
    %76 = vector.broadcast %cst_31 : f32 to vector<8x1xf32>
    %77 = arith.divf %75, %76 : vector<8x1xf32>
    %78 = vector.broadcast %70 : vector<8x1xf32> to vector<8x32xf32>
    %79 = arith.subf %62, %78 : vector<8x32xf32>
    %cst_32 = arith.constant 9.99999974E-6 : f32
    %80 = vector.broadcast %cst_32 : f32 to vector<8x1xf32>
    %81 = arith.addf %77, %80 : vector<8x1xf32>
    %82 = math.rsqrt %81 : vector<8x1xf32>
    %83 = vector.broadcast %82 : vector<8x1xf32> to vector<8x32xf32>
    %84 = arith.mulf %79, %83 : vector<8x32xf32>
    %85 = vector.broadcast %64 : vector<1x32xf32> to vector<8x32xf32>
    %86 = arith.mulf %84, %85 : vector<8x32xf32>
    %87 = vector.broadcast %66 : vector<1x32xf32> to vector<8x32xf32>
    %88 = arith.addf %86, %87 : vector<8x32xf32>
    %89 = arith.truncf %88 : vector<8x32xf32> to vector<8x32xbf16>
    %c0_33 = arith.constant 0 : index
    %c0_34 = arith.constant 0 : index
    %c0_35 = arith.constant 0 : index
    %90 = vector.load %arg9[%c0_33, %c0_34, %c0_35] : memref<1x32x64xbf16, #tpu.memory_space<vmem>>, vector<1x32x64xbf16>
    %91 = vector.shape_cast %90 : vector<1x32x64xbf16> to vector<32x64xbf16>
    %cst_36 = arith.constant dense<0.000000e+00> : vector<8x64xf32>
    %92 = tpu.matmul %89, %91, %cst_36 {dimension_numbers = #tpu.dot_dimension_numbers<[1], [0], [0], [1], [0, 0, 1, 1], [], []>} : vector<8x32xbf16>, vector<32x64xbf16>, vector<8x64xf32> -> vector<8x64xf32>
    %c0_37 = arith.constant 0 : index
    %c0_38 = arith.constant 0 : index
    %c0_39 = arith.constant 0 : index
    %93 = vector.load %arg10[%c0_37, %c0_38, %c0_39] : memref<1x1x64xf32, #tpu.memory_space<vmem>>, vector<1x1x64xf32>
    %94 = vector.shape_cast %93 : vector<1x1x64xf32> to vector<1x64xf32>
    %95 = vector.broadcast %94 : vector<1x64xf32> to vector<8x64xf32>
    %96 = arith.addf %92, %95 : vector<8x64xf32>
    %cst_40 = arith.constant 0.000000e+00 : f32
    %97 = vector.broadcast %cst_40 : f32 to vector<8x64xf32>
    %98 = arith.maximumf %96, %97 : vector<8x64xf32>
    %99 = arith.truncf %98 : vector<8x64xf32> to vector<8x64xbf16>
    %c0_41 = arith.constant 0 : index
    %c0_42 = arith.constant 0 : index
    %c0_43 = arith.constant 0 : index
    %100 = vector.load %arg11[%c0_41, %c0_42, %c0_43] : memref<1x64x32xbf16, #tpu.memory_space<vmem>>, vector<1x64x32xbf16>
    %101 = vector.shape_cast %100 : vector<1x64x32xbf16> to vector<64x32xbf16>
    %cst_44 = arith.constant dense<0.000000e+00> : vector<8x32xf32>
    %102 = tpu.matmul %99, %101, %cst_44 {dimension_numbers = #tpu.dot_dimension_numbers<[1], [0], [0], [1], [0, 0, 1, 1], [], []>} : vector<8x64xbf16>, vector<64x32xbf16>, vector<8x32xf32> -> vector<8x32xf32>
    %c0_45 = arith.constant 0 : index
    %c0_46 = arith.constant 0 : index
    %c0_47 = arith.constant 0 : index
    %103 = vector.load %arg12[%c0_45, %c0_46, %c0_47] : memref<1x1x32xf32, #tpu.memory_space<vmem>>, vector<1x1x32xf32>
    %104 = vector.shape_cast %103 : vector<1x1x32xf32> to vector<1x32xf32>
    %105 = vector.broadcast %104 : vector<1x32xf32> to vector<8x32xf32>
    %106 = arith.addf %102, %105 : vector<8x32xf32>
    %107 = arith.addf %88, %106 : vector<8x32xf32>
    %c0_48 = arith.constant 0 : index
    %c0_49 = arith.constant 0 : index
    %c0_50 = arith.constant 0 : index
    %108 = vector.load %arg13[%c0_48, %c0_49, %c0_50] : memref<1x1x32xf32, #tpu.memory_space<vmem>>, vector<1x1x32xf32>
    %109 = vector.shape_cast %108 : vector<1x1x32xf32> to vector<1x32xf32>
    %c0_51 = arith.constant 0 : index
    %c0_52 = arith.constant 0 : index
    %c0_53 = arith.constant 0 : index
    %110 = vector.load %arg14[%c0_51, %c0_52, %c0_53] : memref<1x1x32xf32, #tpu.memory_space<vmem>>, vector<1x1x32xf32>
    %111 = vector.shape_cast %110 : vector<1x1x32xf32> to vector<1x32xf32>
    %cst_54 = arith.constant dense<0.000000e+00> : vector<8xf32>
    %112 = vector.multi_reduction <add>, %107, %cst_54 [1] : vector<8x32xf32> to vector<8xf32>
    %113 = vector.shape_cast %112 : vector<8xf32> to vector<8x1xf32>
    %cst_55 = arith.constant 3.200000e+01 : f32
    %114 = vector.broadcast %cst_55 : f32 to vector<8x1xf32>
    %115 = arith.divf %113, %114 : vector<8x1xf32>
    %116 = vector.broadcast %115 : vector<8x1xf32> to vector<8x32xf32>
    %117 = arith.subf %107, %116 : vector<8x32xf32>
    %118 = arith.mulf %117, %117 : vector<8x32xf32>
    %cst_56 = arith.constant dense<0.000000e+00> : vector<8xf32>
    %119 = vector.multi_reduction <add>, %118, %cst_56 [1] : vector<8x32xf32> to vector<8xf32>
    %120 = vector.shape_cast %119 : vector<8xf32> to vector<8x1xf32>
    %cst_57 = arith.constant 3.200000e+01 : f32
    %121 = vector.broadcast %cst_57 : f32 to vector<8x1xf32>
    %122 = arith.divf %120, %121 : vector<8x1xf32>
    %123 = vector.broadcast %115 : vector<8x1xf32> to vector<8x32xf32>
    %124 = arith.subf %107, %123 : vector<8x32xf32>
    %cst_58 = arith.constant 9.99999974E-6 : f32
    %125 = vector.broadcast %cst_58 : f32 to vector<8x1xf32>
    %126 = arith.addf %122, %125 : vector<8x1xf32>
    %127 = math.rsqrt %126 : vector<8x1xf32>
    %128 = vector.broadcast %127 : vector<8x1xf32> to vector<8x32xf32>
    %129 = arith.mulf %124, %128 : vector<8x32xf32>
    %130 = vector.broadcast %109 : vector<1x32xf32> to vector<8x32xf32>
    %131 = arith.mulf %129, %130 : vector<8x32xf32>
    %132 = vector.broadcast %111 : vector<1x32xf32> to vector<8x32xf32>
    %133 = arith.addf %131, %132 : vector<8x32xf32>
    %134 = vector.shape_cast %133 : vector<8x32xf32> to vector<1x8x32xf32>
    %c0_59 = arith.constant 0 : index
    %c0_60 = arith.constant 0 : index
    %c0_61 = arith.constant 0 : index
    %135 = vector.load %arg15[%c0_59, %c0_60, %c0_61] : memref<1x8x32xf32, #tpu.memory_space<vmem>>, vector<1x8x32xf32>
    tpu.vector_store %arg15[%c0_59, %c0_60, %c0_61], %134 {strides = array<i32>} : memref<1x8x32xf32, #tpu.memory_space<vmem>>, vector<1x8x32xf32>,
    return
  }
  func.func @transform_0(%arg0: i32, %arg1: i32) -> (i32, i32, i32) {
    %c0_i32 = arith.constant 0 : i32
    %c0_i32_0 = arith.constant 0 : i32
    %c0_i32_1 = arith.constant 0 : i32
    return %arg0, %c0_i32, %c0_i32_0 : i32, i32, i32
  }
  func.func @transform_1(%arg0: i32, %arg1: i32) -> (i32, i32, i32) {
    %c0_i32 = arith.constant 0 : i32
    %c0_i32_0 = arith.constant 0 : i32
    %c0_i32_1 = arith.constant 0 : i32
    return %arg1, %c0_i32, %c0_i32_0 : i32, i32, i32
  }
  func.func @transform_2(%arg0: i32, %arg1: i32) -> (i32, i32, i32) {
    %c0_i32 = arith.constant 0 : i32
    %c0_i32_0 = arith.constant 0 : i32
    %c0_i32_1 = arith.constant 0 : i32
    return %arg1, %c0_i32, %c0_i32_0 : i32, i32, i32
  }
  func.func @transform_3(%arg0: i32, %arg1: i32) -> (i32, i32, i32) {
    %c0_i32 = arith.constant 0 : i32
    %c0_i32_0 = arith.constant 0 : i32
    %c0_i32_1 = arith.constant 0 : i32
    return %arg1, %c0_i32, %c0_i32_0 : i32, i32, i32
  }
  func.func @transform_4(%arg0: i32, %arg1: i32) -> (i32, i32, i32) {
    %c0_i32 = arith.constant 0 : i32
    %c0_i32_0 = arith.constant 0 : i32
    %c0_i32_1 = arith.constant 0 : i32
    return %arg1, %c0_i32, %c0_i32_0 : i32, i32, i32
  }
  func.func @transform_5(%arg0: i32, %arg1: i32) -> (i32, i32, i32) {
    %c0_i32 = arith.constant 0 : i32
    %c0_i32_0 = arith.constant 0 : i32
    %c0_i32_1 = arith.constant 0 : i32
    return %arg1, %c0_i32, %c0_i32_0 : i32, i32, i32
  }
  func.func @transform_6(%arg0: i32, %arg1: i32) -> (i32, i32, i32) {
    %c0_i32 = arith.constant 0 : i32
    %c0_i32_0 = arith.constant 0 : i32
    %c0_i32_1 = arith.constant 0 : i32
    return %arg1, %c0_i32, %c0_i32_0 : i32, i32, i32
  }
  func.func @transform_7(%arg0: i32, %arg1: i32) -> (i32, i32, i32) {
    %c0_i32 = arith.constant 0 : i32
    %c0_i32_0 = arith.constant 0 : i32
    %c0_i32_1 = arith.constant 0 : i32
    return %arg1, %c0_i32, %c0_i32_0 : i32, i32, i32
  }
  func.func @transform_8(%arg0: i32, %arg1: i32) -> (i32, i32, i32) {
    %c0_i32 = arith.constant 0 : i32
    %c0_i32_0 = arith.constant 0 : i32
    %c0_i32_1 = arith.constant 0 : i32
    return %arg1, %c0_i32, %c0_i32_0 : i32, i32, i32
  }
  func.func @transform_9(%arg0: i32, %arg1: i32) -> (i32, i32, i32) {
    %c0_i32 = arith.constant 0 : i32
    %c0_i32_0 = arith.constant 0 : i32
    %c0_i32_1 = arith.constant 0 : i32
    return %arg1, %c0_i32, %c0_i32_0 : i32, i32, i32
  }
  func.func @transform_10(%arg0: i32, %arg1: i32) -> (i32, i32, i32) {
    %c0_i32 = arith.constant 0 : i32
    %c0_i32_0 = arith.constant 0 : i32
    %c0_i32_1 = arith.constant 0 : i32
    return %arg1, %c0_i32, %c0_i32_0 : i32, i32, i32
  }
  func.func @transform_11(%arg0: i32, %arg1: i32) -> (i32, i32, i32) {
    %c0_i32 = arith.constant 0 : i32
    %c0_i32_0 = arith.constant 0 : i32
    %c0_i32_1 = arith.constant 0 : i32
    return %arg1, %c0_i32, %c0_i32_0 : i32, i32, i32
  }
  func.func @transform_12(%arg0: i32, %arg1: i32) -> (i32, i32, i32) {
    %c0_i32 = arith.constant 0 : i32
    %c0_i32_0 = arith.constant 0 : i32
    %c0_i32_1 = arith.constant 0 : i32
    return %arg1, %c0_i32, %c0_i32_0 : i32, i32, i32
  }
  func.func @transform_13(%arg0: i32, %arg1: i32) -> (i32, i32, i32) {
    %c0_i32 = arith.constant 0 : i32
    %c0_i32_0 = arith.constant 0 : i32
    %c0_i32_1 = arith.constant 0 : i32
    return %arg0, %c0_i32, %c0_i32_0 : i32, i32, i32
  }
}

</mosaic_0001>

<bundles_post_ra>
// kernel: vit_encoder_forward.2
= control target key start
LH: loop header
LB: loop body
LE: loop exit
PB: predicated region body
PF: predicated region fallthrough
CT: control target
= control target key end

     0   :  { %vm122_vm0 = vcmask 523264   ;;  %vm152_vm1 = vcmask 261120   ;;  %s285_s1 = inlined_call_operand.vmem [shape: bf16[192,32], index: 1, kind: input, shape index: {}]   ;;  %s286_s0 = inlined_call_operand.vmem [shape: bf16[8,192], index: 0, kind: input, shape index: {}]   ;;  %s287_s2 = inlined_call_operand.vmem [shape: f32[1,32], index: 2, kind: input, shape index: {}]   ;;  %s288_s3 = inlined_call_operand.vmem [shape: f32[8,32], index: 3, kind: output, shape index: {}]  }
   0x1   :  { %v214_v0 = vld [vmem:[%s285_s1 + $0x38] sm:$0xff]  ;;  %v213_v2 = vld [vmem:[%s285_s1 + $0x30] sm:$0xff]  ;;  %v212_v4 = vld [vmem:[%s285_s1 + $0x28] sm:$0xff] }
   0x2   :  { %v218_v1 = vld [vmem:[%s285_s1 + $0x58] sm:$0xff]  ;;  %126 = vmatpush.bf16.msra.mxu0 %v214_v0  ;;  %v217_v3 = vld [vmem:[%s285_s1 + $0x50] sm:$0xff]  ;;  %v216_v5 = vld [vmem:[%s285_s1 + $0x48] sm:$0xff] }
   0x3   :  { %143 = vmatpush.bf16.msra.mxu1 %v218_v1  ;;  %v15_v6 = vld [vmem:[%s286_s0] sm:$0xff]  ;;  %v210_v10 = vld [vmem:[%s285_s1 + $0x18] sm:$0xff]  ;;  %v209_v12 = vld [vmem:[%s285_s1 + $0x10] sm:$0xff] }
   0x4   :  { %v211_v7 = vld [vmem:[%s285_s1 + $0x20] sm:$0xff]  ;;  %v46_v8 = vunpack.c.h.b16 %v15_v6  ;;  %v208_v13 = vld [vmem:[%s285_s1 + $0x8] sm:$0xff]  ;;  %v45_v14 = vunpack.c.l.b16 %v15_v6 }
   0x5   :  { %v215_v9 = vld [vmem:[%s285_s1 + $0x40] sm:$0xff] }
   0x6   :  { %127 = vmatpush.bf16.msra.mxu0 %v213_v2  ;;  %v48_v11 = vpack.c.b16 %v46_v8, %v46_v8  ;;  %v207_v15 = vld [vmem:[%s285_s1] sm:$0xff]  ;;  %v47_v16 = vpack.c.b16 %v45_v14, %v45_v14 }
   0x7   :  { %144 = vmatpush.bf16.msra.mxu1 %v217_v3  ;;  %v219_v19 = vld [vmem:[%s287_s2] ss:$0 sm:$0xff] }
   0xa   :  { %128 = vmatpush.bf16.msra.mxu0 %v212_v4 }
   0xb   :  { %145 = vmatpush.bf16.msra.mxu1 %v216_v5 }
   0xe   :  { %129 = vmatpush.bf16.msra.mxu0 %v211_v7 }
   0xf   :  { %146 = vmatpush.bf16.msra.mxu1 %v215_v9 }
  0x12   :  { %130 = vmatpush.bf16.msra.mxu0 %v210_v10  ;;  %206 = vmatmul.msk.bf16.vlgmr.msra.gmra.mxu1 %vm122_vm0, %v48_v11 }
  0x16   :  { %131 = vmatpush.bf16.msra.mxu0 %v209_v12 }
  0x1a   :  { %132 = vmatpush.bf16.msra.mxu0 %v208_v13 }
  0x1e   :  { %133 = vmatpush.bf16.msra.mxu0 %v207_v15 }
  0x21   :  { %134 = vmatmul.bf16.vlgmr.msra.gmra.mxu0 %v47_v16 }
  0x8f   :  { %v148_v17 = vpop.f32.mrf.mxu1 }
  0x97   :  { %v150_v18 = vpop.f32.mrf.mxu1 }
  0x9e   :  { %v135_v20 = vpop.f32.mrf.mxu0 }
  0x9f   :  { %v136_v21 = vadd.f32 %v219_v19, %v135_v20 }
  0xa1   :  { %v149_v22 = vadd.f32 %v148_v17, %v136_v21 }
  0xa3   :  { %153 = vst.msk [vmem:[%s288_s3] sm:$0xff] %vm152_vm1, %v149_v22 }
  0xa6   :  { %v137_v23 = vpop.f32.mrf.mxu0 }

// kernel: vit_encoder_forward.3
= control target key start
LH: loop header
LB: loop body
LE: loop exit
PB: predicated region body
PF: predicated region fallthrough
CT: control target
= control target key end

     0   :  { %s2099_s25 = smov 0   ;;  %s2101_s26 = smov 0   ;;  %s2487_s0 = inlined_call_operand.vmem [shape: f32[2,8,32], index: 0, kind: input, shape index: {}]   ;;  %s2488_s1 = inlined_call_operand.vmem [shape: bf16[2,32,96], index: 1, kind: input, shape index: {}]   ;;  %s2489_s2 = inlined_call_operand.vmem [shape: f32[2,1,96], index: 2, kind: input, shape index: {}]   ;;  %s2490_s3 = inlined_call_operand.vmem [shape: bf16[2,32,32], index: 3, kind: input, shape index: {}]   ;;  %s2491_s4 = inlined_call_operand.vmem [shape: f32[2,1,32], index: 4, kind: input, shape index: {}]   ;;  %s2492_s5 = inlined_call_operand.vmem [shape: f32[2,1,32], index: 5, kind: input, shape index: {}]   ;;  %s2493_s6 = inlined_call_operand.vmem [shape: f32[2,1,32], index: 6, kind: input, shape index: {}]   ;;  %s2494_s7 = inlined_call_operand.vmem [shape: bf16[2,32,64], index: 7, kind: input, shape index: {}]   ;;  %s2495_s8 = inlined_call_operand.vmem [shape: f32[2,1,64], index: 8, kind: input, shape index: {}]   ;;  %s2496_s9 = inlined_call_operand.vmem [shape: bf16[2,64,32], index: 9, kind: input, shape index: {}]   ;;  %s2497_s10 = inlined_call_operand.vmem [shape: f32[2,1,32], index: 10, kind: input, shape index: {}]   ;;  %s2498_s11 = inlined_call_operand.vmem [shape: f32[2,1,32], index: 11, kind: input, shape index: {}]   ;;  %s2499_s12 = inlined_call_operand.vmem [shape: f32[2,1,32], index: 12, kind: input, shape index: {}]   ;;  %s2500_s13 = inlined_call_operand.vmem [shape: f32[2,8,32], index: 13, kind: output, shape index: {}]  }
   0x1   :  { %2505 = sst [smem:[#allocation8_spill]] %s2487_s0  ;;  %s2103_s27 = smov 0  }
   0x2   :  { %2506 = sst [smem:[#allocation9_spill]] %s2488_s1  ;;  %s2105_s28 = smov 0  }
   0x3   :  { %2507 = sst [smem:[#allocation10_spill]] %s2489_s2  ;;  %s2107_s29 = smov 0  }
   0x4   :  { %2508 = sst [smem:[#allocation11_spill]] %s2490_s3 }
   0x5   :  { %2509 = sst [smem:[#allocation12_spill]] %s2494_s7 }
   0x6   :  { %2510 = sst [smem:[#allocation13_spill]] %s2495_s8 }
   0x7   :  { %2511 = sst [smem:[#allocation14_spill]] %s2499_s12 }
   0x8   :  { %2512 = sst [smem:[#allocation15_spill]] %s2500_s13 }
   0x9 LB: > { %2513 = sst [smem:[#allocation2_spill]] %s2000_s25  ;;  %s32_s30 = sadd.s32 1, %s2008_s27  ;;  %s2016_s29 = sphi %s2107_s29, %s23_s29   ;;  %s2012_s28 = sphi %s2105_s28, %s2538_s28   ;;  %s2008_s27 = sphi %s2103_s27, %s2537_s27   ;;  %s2004_s26 = sphi %s2101_s26, %s2536_s26   ;;  %s2000_s25 = sphi %s2099_s25, %s2535_s25  }
   0xa   : > { %2514 = sst [smem:[#allocation3_spill]] %s2008_s27  ;;  %s35_s14 = sadd.s32 1, %s2012_s28 }
   0xb   : > { %2515 = sst [smem:[#allocation4_spill]] %s2012_s28  ;;  %p33_p0 = scmp.ge.s32.totalorder %s32_s30, 2 }
   0xc   : > { %2516 = sst [smem:[#allocation5_spill]] %s2016_s29  ;;  %p1797_p1 = scmp.ge.s32.totalorder %s2016_s29, 1 }
   0xd   : > { %p502_p2 = scmp.lt.s32.totalorder %s2016_s29, 5  ;;  %s2540_s30 = smov (%p33_p0, %s32_s30), 0 }
   0xe   : > { %2517 = sst [smem:[#allocation6_spill]] %s2540_s30  ;;  %s2542_s14 = smov (!%p33_p0, %s35_s14), %s2012_s28 }
   0xf   : > { %p503_p3 = pnand %p1797_p1, %p502_p2  ;;  %p37_p4 = scmp.ge.s32.totalorder %s2542_s14, 2 }
  0x10   : > { %p588_p5 = scmp.lt.s32.totalorder (!%p503_p3), %s2004_s26, 1  ;;  %p592_p6 = scmp.lt.s32.totalorder (!%p503_p3), %s2000_s25, 1 }
  0x11   : > { %s2544_s14 = smov (%p37_p4, %s2542_s14), 0  ;;  %506 = sbr.rel (%p503_p3) target bundleno = 2070 (0x816), region = 72 }
  0x12   : > { %2518 = sst [smem:[#allocation7_spill]] %s2544_s14 }
  0x13   : > { %s2519_s0 = sld [smem:[#allocation8_spill]] (!%p503_p3) }
  0x14   : > { %s2520_s1 = sld [smem:[#allocation9_spill]] (!%p503_p3) }
  0x15   : > { %s2521_s2 = sld [smem:[#allocation10_spill]] (!%p503_p3) }
  0x16   : > { %s2546_s26 = smov (!%p588_p5, %s2004_s26), 1  ;;  %s2522_s3 = sld [smem:[#allocation11_spill]] }
  0x17   : > { %s2133_s15 = scalar_select %p592_p6, %s2000_s25, 1 }
  0x18   : > { %s1798_s16 = sshll.u32 %s2546_s26, 3  ;;  %s2523_s7 = sld [smem:[#allocation12_spill]] }
  0x19   : > { %s591_s19 = scalar_lea.vmem %s2519_s0, %s1798_s16  ;;  %s1863_s20 = sshll.u32 %s2133_s15, 4 }
  0x1a   : > { %s596_s23 = scalar_lea.vmem %s2520_s1, %s1863_s20  ;;  %s629_s13 = scalar_lea.vmem %s2497_s10, %s2133_s15 }
  0x1b   : > { %s599_s30 = scalar_lea.vmem %s2521_s2, %s2133_s15  ;;  %s632_s1 = scalar_lea.vmem %s2498_s11, %s2133_s15 }
  0x1c   : > { %s2149_s29 = scalar_lea.vmem %s2522_s3, %s1863_s20  ;;  %s1866_s3 = sshll.u32 %s2133_s15, 5 }
  0x1d   : > { %s2180_s0 = scalar_lea.vmem %s2496_s9, %s1866_s3  ;;  %s2525_s22 = sld [smem:[#allocation14_spill]] }
  0x1e   : > { %s2166_s24 = scalar_lea.vmem %s2523_s7, %s1863_s20  ;;  %s2526_s2 = sld [smem:[#allocation15_spill]] }
  0x1f   : > { %s2527_s25 = sld [smem:[#allocation2_spill]] }
  0x23   : > { %s635_s7 = scalar_lea.vmem %s2525_s22, %s2133_s15 }
  0x24   : > { %s2193_s8 = scalar_lea.vmem %s2526_s2, %s1798_s16 }
  0x25   : > { %p1808_p7 = scmp.ne.s32.totalorder %s2527_s25, 0 }
  0x27   : > { %644 = sbr.rel (%p1808_p7) target bundleno = 46 (0x2e), region = 76 }
  0x2c   : > { %v645_v0 = vld [vmem:[%s591_s19] sm:$0xff]  ;;  %vm646_vm0 = vcmask 261120  }
  0x2d   : > { %647 = vst.msk [vmem:[%s2193_s8] sm:$0xff] %vm646_vm0, %v645_v0 }
  0x2e PF: > { %v1868_v1 = vld [vmem:[%s596_s23 + $0x8] sm:$0xff]  ;;  %v1867_v2 = vld [vmem:[%s596_s23] sm:$0xff]  ;;  %vm670_vm1 = vcmask 261120   ;;  %s2018_s2 = smov 104   ;;  %s2019_s3 = smov 120   ;;  %vm698_vm2 = vcmask 1047556  }
  0x2f   : > { %680 = vmatpush.bf16.msra.mxu0 %v1868_v1  ;;  %v1948_v5 = vld [vmem:[%s599_s30] ss:$0 sm:$0xff]  ;;  %s2020_s16 = smov 112   ;;  %s2021_s19 = smov 96   ;;  %v2022_v15 = vmov 1983009808  }
  0x30   : > { %v703_v16 = vunpack.c.l.s4 %v2022_v15  ;;  %v2023_v29 = vmov 1934713408   ;;  %vm1060_vm3 = vcmask 64512   ;;  %s2024_s30 = smov 64   ;;  %vm1205_vm5 = vcmask 1043456   ;;  %s2025_s23 = smov 16  }
  0x31   : > { %v727_v30 = vunpack.c.l.s4 %v2023_v29  ;;  %s2026_s22 = smov 8   ;;  %s2027_s26 = smov 24   ;;  %vm1402_vm6 = vcmask 130048   ;;  %vm1404_vm7 = vcmask 195584   ;;  %vm1558_vm12 = vcmask 523264  }
  0x32   : > { %v2211_v20 = vunpack.c.0.s8 %v703_v16  ;;  %s2528_s12 = scalar_lea.vmem %s2491_s4, %s2133_s15  ;;  %s2529_s21 = scalar_lea.vmem %s2492_s5, %s2133_s15 }
  0x33   : > { %681 = vmatpush.bf16.msra.mxu0 %v1867_v2  ;;  %v2221_v35 = vunpack.c.0.s8 %v727_v30  ;;  %s2530_s27 = scalar_lea.vmem %s2493_s6, %s2133_s15 }
  0x34   : > { %v2198_v3 = vld [vmem:[%s2193_s8] sm:$0xff] }
  0x35   : > { %v649_v4 = vpack.c.bf16 %v2198_v3, %v2198_v3 }
  0x37   : > { %1817 = vmatmul.msk.bf16.vlgmr.msra.gmra.mxu0 %vm670_vm1, %v649_v4 }
  0xb4   : > { %v683_v6 = vpop.f32.mrf.mxu0 }
  0xb5   : > { %v684_v7 = vadd.f32 %v1948_v5, %v683_v6 }
  0xb7   : > { %694 = vrot.lane.b32.xlu1 %v684_v7, %s2018_s2  ;;  %688 = vrot.lane.b32.xlu0 %v684_v7, %s2019_s3  ;;  %v700_v17 = vrot.slane %v684_v7, 4  ;;  %s2531_s2 = sld [smem:[#allocation13_spill]] }
  0xbc   : > { %v685_v8 = vpop.f32.mrf.mxu0 }
  0xbd   : > { %s2532_s3 = scalar_lea.vmem %s2531_s2, %s2133_s15 }
  0xbf   : > { %691 = vrot.lane.b32.xlu0 %v684_v7, %s2020_s16 }
 0x129   : > { %v689_v9 = vpop.permute.xlu0 %688  ;;  %v695_v11 = vpop.permute.xlu1 %694 }
 0x12a   : > { %v2203_v10 = vpack.i.bf16 %v689_v9, %v684_v7  ;;  %v710_v21 = vrot.slane %v695_v11, 4  ;;  %v712_v22 = vrot.slane %v689_v9, 4 }
 0x12c   : > { %1929 = vrot.lane.b32.xlu1 %v2203_v10, %s2021_s19  ;;  %v711_v25 = vsel %vm698_vm2, %v710_v21, %v689_v9  ;;  %v713_v26 = vsel %vm698_vm2, %v695_v11, %v712_v22 }
 0x12d   : > { %v717_v31 = vperm.slane %v711_v25, %v2211_v20  ;;  %v721_v32 = vperm.slane %v713_v26, %v2211_v20 }
 0x12f   : > { %v722_v36 = vrot.slane %v717_v31, 4  ;;  %v734_v37 = vrot.slane %v721_v32, 4 }
 0x131   : > { %v692_v12 = vpop.permute.xlu0 %691 }
 0x132   : > { %v2206_v13 = vpack.i.bf16 %v695_v11, %v692_v12  ;;  %v697_v14 = vrot.slane %v692_v12, 4  ;;  %v701_v19 = vsel %vm698_vm2, %v692_v12, %v700_v17 }
 0x133   : > { %v709_v24 = vperm.slane %v701_v19, %v2211_v20 }
 0x134   : > { %1934 = vrot.lane.b32.xlu2 %v2206_v13, %s2021_s19  ;;  %v699_v18 = vsel %vm698_vm2, %v697_v14, %v684_v7 }
 0x135   : > { %v705_v23 = vperm.slane %v699_v18, %v2211_v20  ;;  %v736_v28 = vrot.slane %v709_v24, 4  ;;  %v735_v42 = vsel %vm698_vm2, %v734_v37, %v709_v24 }
 0x136   : > { %v741_v46 = vperm.slane %v735_v42, %v2221_v35 }
 0x137   : > { %v724_v27 = vrot.slane %v705_v23, 4  ;;  %v737_v34 = vsel %vm698_vm2, %v721_v32, %v736_v28  ;;  %v723_v41 = vsel %vm698_vm2, %v722_v36, %v705_v23 }
 0x138   : > { %v745_v39 = vperm.slane %v737_v34, %v2221_v35  ;;  %v729_v45 = vperm.slane %v723_v41, %v2221_v35  ;;  %v750_v56 = vrot.slane %v741_v46, 4 }
 0x139   : > { %v725_v33 = vsel %vm698_vm2, %v717_v31, %v724_v27 }
 0x13a   : > { %v733_v38 = vperm.slane %v725_v33, %v2221_v35  ;;  %v752_v48 = vrot.slane %v745_v39, 4  ;;  %v746_v54 = vrot.slane %v729_v45, 4  ;;  %v751_v12 = vsel %vm698_vm2, 0.0, %v750_v56 }
 0x13c   : > { %v748_v47 = vrot.slane %v733_v38, 4  ;;  %v753_v57 = vsel %vm698_vm2, 0.0, %v752_v48  ;;  %v765_v62 = vsel %vm698_vm2, %v752_v48, %v741_v46  ;;  %v747_v11 = vsel %vm698_vm2, 0.0, %v746_v54 }
 0x13d   : > { %v770_v2 = vrot.slane %v753_v57, 4  ;;  %v769_v19 = vperm.slane %v765_v62, %v2211_v20 }
 0x13e   : > { %v749_v55 = vsel %vm698_vm2, 0.0, %v748_v47  ;;  %v754_v14 = vsel %vm698_vm2, %v748_v47, %v729_v45 }
 0x13f   : > { %v759_v1 = vrot.slane %v749_v55, 4  ;;  %v771_v24 = vsel %vm698_vm2, %v770_v2, %v751_v12  ;;  %v758_v27 = vperm.slane %v754_v14, %v2211_v20  ;;  %v790_v41 = vrot.slane %v769_v19, 4 }
 0x140   : > { %v775_v37 = vperm.slane %v771_v24, %v2211_v20 }
 0x141   : > { %v760_v23 = vsel %vm698_vm2, %v759_v1, %v747_v11 }
 0x142   : > { %v764_v32 = vperm.slane %v760_v23, %v2211_v20 }
 0x18e   : > { %v1935_v40 = vpop.permute.xlu2 %1934 }
 0x18f   : > { %v1937_v43 = vunpack.i.h.bf16 %v1935_v40  ;;  %v1936_v44 = vunpack.i.l.bf16 %v1935_v40  ;;  %v778_v40 = vrot.slane %v758_v27, 4 }
 0x191   : > { %v832_v50 = vrot.slane %v1937_v43, 4  ;;  %v820_v51 = vrot.slane %v1936_v44, 4 }
 0x19e   : > { %v1930_v49 = vpop.permute.xlu1 %1929 }
 0x19f   : > { %v1932_v52 = vunpack.i.h.bf16 %v1930_v49  ;;  %v1931_v53 = vunpack.i.l.bf16 %v1930_v49  ;;  %v776_v49 = vrot.slane %v764_v32, 4 }
 0x1a1   : > { %v834_v58 = vrot.slane %v1932_v52, 4  ;;  %v821_v59 = vsel %vm698_vm2, %v820_v51, %v1931_v53  ;;  %v822_v60 = vrot.slane %v1931_v53, 4  ;;  %v833_v61 = vsel %vm698_vm2, %v832_v50, %v1932_v52 }
 0x1a2   : > { %v827_v63 = vperm.slane %v821_v59, %v2211_v20  ;;  %v839_v0 = vperm.slane %v833_v61, %v2211_v20  ;;  %v788_v53 = vrot.slane %v775_v37, 4  ;;  %v779_v59 = vsel %vm698_vm2, %v764_v32, %v778_v40 }
 0x1a3   : > { %v823_v4 = vsel %vm698_vm2, %v1936_v44, %v822_v60  ;;  %v835_v5 = vsel %vm698_vm2, %v1937_v43, %v834_v58  ;;  %v791_v61 = vsel %vm698_vm2, %v775_v37, %v790_v41  ;;  %v777_v62 = vsel %vm698_vm2, %v776_v49, %v758_v27 }
 0x1a4   : > { %v831_v6 = vperm.slane %v823_v4, %v2211_v20  ;;  %v843_v7 = vperm.slane %v835_v5, %v2211_v20  ;;  %v844_v8 = vrot.slane %v839_v0, 4  ;;  %v846_v9 = vrot.slane %v827_v63, 4 }
 0x1a5   : > { %v789_v2 = vsel %vm698_vm2, %v788_v53, %v769_v19  ;;  %v783_v11 = vperm.slane %v777_v62, %v2221_v35 }
 0x1a6   : > { %v845_v15 = vsel %vm698_vm2, %v844_v8, %v827_v63  ;;  %v847_v16 = vsel %vm698_vm2, %v839_v0, %v846_v9  ;;  %v856_v17 = vrot.slane %v843_v7, 4  ;;  %v858_v18 = vrot.slane %v831_v6, 4 }
 0x1a7   : > { %v851_v21 = vperm.slane %v845_v15, %v2221_v35  ;;  %v855_v22 = vperm.slane %v847_v16, %v2221_v35  ;;  %v799_v9 = vperm.slane %v791_v61, %v2221_v35 }
 0x1a8   : > { %v857_v25 = vsel %vm698_vm2, %v856_v17, %v831_v6  ;;  %v859_v26 = vsel %vm698_vm2, %v843_v7, %v858_v18  ;;  %v787_v7 = vperm.slane %v779_v59, %v2221_v35  ;;  %v795_v18 = vperm.slane %v789_v2, %v2221_v35 }
 0x1a9   : > { %v863_v28 = vperm.slane %v857_v25, %v2221_v35  ;;  %v867_v29 = vperm.slane %v859_v26, %v2221_v35  ;;  %v868_v30 = vrot.slane %v851_v21, 4  ;;  %v870_v31 = vrot.slane %v855_v22, 4 }
 0x1aa   : > { %v806_v23 = vrot.slane %v787_v7, 4 }
 0x1ab   : > { %v871_v33 = vsel %vm698_vm2, 0.0, %v870_v31  ;;  %v872_v34 = vrot.slane %v863_v28, 4  ;;  %v874_v36 = vrot.slane %v867_v29, 4  ;;  %v876_v38 = vsel %vm698_vm2, %v870_v31, %v851_v21 }
 0x1ac   : > { %v881_v39 = vrot.slane %v871_v33, 4  ;;  %v869_v42 = vsel %vm698_vm2, 0.0, %v868_v30  ;;  %v880_v44 = vperm.slane %v876_v38, %v2211_v20  ;;  %v804_v29 = vrot.slane %v799_v9, 4 }
 0x1ad   : > { %v875_v43 = vsel %vm698_vm2, 0.0, %v874_v36  ;;  %v887_v45 = vsel %vm698_vm2, %v874_v36, %v863_v28  ;;  %v873_v50 = vsel %vm698_vm2, 0.0, %v872_v34  ;;  %v802_v28 = vrot.slane %v783_v11, 4 }
 0x1ae   : > { %v892_v46 = vrot.slane %v875_v43, 4  ;;  %v882_v47 = vsel %vm698_vm2, %v881_v39, %v869_v42  ;;  %v891_v48 = vperm.slane %v887_v45, %v2211_v20  ;;  %v900_v52 = vrot.slane %v880_v44, 4 }
 0x1af   : > { %v886_v51 = vperm.slane %v882_v47, %v2211_v20  ;;  %v807_v33 = vsel %vm698_vm2, %v799_v9, %v806_v23  ;;  %v800_v34 = vrot.slane %v795_v18, 4  ;;  %v803_v37 = vsel %vm698_vm2, %v795_v18, %v802_v28 }
 0x1b0   : > { %v893_v54 = vsel %vm698_vm2, %v892_v46, %v873_v50  ;;  %v912_v55 = vrot.slane %v891_v48, 4  ;;  %v805_v38 = vsel %vm698_vm2, %v804_v29, %v787_v7  ;;  %v1055_v39 = vpack.c.bf16 %v807_v33, %v807_v33 }
 0x1b1   : > { %v897_v56 = vperm.slane %v893_v54, %v2211_v20  ;;  %v901_v57 = vsel %vm698_vm2, %v886_v51, %v900_v52  ;;  %v898_v58 = vrot.slane %v886_v51, 4  ;;  %v801_v40 = vsel %vm698_vm2, %v800_v34, %v783_v11 }
 0x1b2   : > { %v909_v60 = vperm.slane %v901_v57, %v2221_v35  ;;  %v1053_v41 = vpack.c.bf16 %v803_v37, %v803_v37  ;;  %v1054_v42 = vpack.c.bf16 %v805_v38, %v805_v38  ;;  %v1052_v43 = vpack.c.bf16 %v801_v40, %v801_v40 }
 0x1b3   : > { %v913_v63 = vsel %vm698_vm2, %v897_v56, %v912_v55  ;;  %v899_v0 = vsel %vm698_vm2, %v898_v58, %v880_v44  ;;  %v910_v1 = vrot.slane %v897_v56, 4  ;;  %v1141_v44 = vlaneseq }
 0x1b4   : > { %v921_v4 = vperm.slane %v913_v63, %v2221_v35  ;;  %v928_v5 = vrot.slane %v909_v60, 4  ;;  %v905_v6 = vperm.slane %v899_v0, %v2221_v35 }
 0x1b5   : > { %v911_v8 = vsel %vm698_vm2, %v910_v1, %v891_v48  ;;  %v1142_v45 = vand.u32 127, %v1141_v44 }
 0x1b6   : > { %v929_v12 = vsel %vm698_vm2, %v921_v4, %v928_v5  ;;  %v917_v14 = vperm.slane %v911_v8, %v2221_v35  ;;  %v924_v15 = vrot.slane %v905_v6, 4  ;;  %v926_v16 = vrot.slane %v921_v4, 4 }
 0x1b7   : > { %v1059_v17 = vpack.c.bf16 %v929_v12, %v929_v12  ;;  %vm1143_vm4 = vcmp.lt.s32.totalorder %v1142_v45, 5 }
 0x1b8   : > { %v925_v19 = vsel %vm698_vm2, %v917_v14, %v924_v15  ;;  %v927_v21 = vsel %vm698_vm2, %v926_v16, %v909_v60  ;;  %v922_v22 = vrot.slane %v917_v14, 4 }
 0x1b9   : > { %v1122_v24 = vsel %vm1060_vm3, %v1059_v17, 0  ;;  %v1057_v25 = vpack.c.bf16 %v925_v19, %v925_v19  ;;  %v1058_v26 = vpack.c.bf16 %v927_v21, %v927_v21 }
 0x1ba   : > { %1131 = vmatpush.bf16.xpose.msrb.mxu0 %v1122_v24  ;;  %v923_v27 = vsel %vm698_vm2, %v922_v22, %v905_v6 }
 0x1bb   : > { %v1084_v30 = vsel %vm1060_vm3, %v1057_v25, 0  ;;  %v1103_v31 = vsel %vm1060_vm3, %v1058_v26, 0  ;;  %v1056_v32 = vpack.c.bf16 %v923_v27, %v923_v27 }
 0x1bc   : > { %1093 = vmatpush.bf16.xpose.msra.mxu2 %v1084_v30  ;;  %1112 = vmatpush.bf16.xpose.msra.mxu3 %v1103_v31 }
 0x1bd   : > { %v1065_v36 = vsel %vm1060_vm3, %v1056_v32, 0 }
 0x1be   : > { %1074 = vmatpush.bf16.xpose.msra.mxu1 %v1065_v36 }
 0x1c1   : > { %1821 = vmatmul.msk.bf16.vlgmr.msrb.gmra.mxu0 %vm1060_vm3, %v1055_v39 }
 0x1c3   : > { %1819 = vmatmul.msk.bf16.vlgmr.msra.gmra.mxu2 %vm1060_vm3, %v1053_v41  ;;  %1820 = vmatmul.msk.bf16.vlgmr.msra.gmra.mxu3 %vm1060_vm3, %v1054_v42 }
 0x1c5   : > { %1818 = vmatmul.msk.bf16.vlgmr.msra.gmra.mxu1 %vm1060_vm3, %v1052_v43 }
 0x23e   : > { %v1133_v46 = vpop.f32.mrf.mxu0 }
 0x23f   : > { %v1140_v47 = vmul.f32 0.35355338, %v1133_v46 }
 0x241   : > { %v1149_v48 = vsel %vm1143_vm4, %v1140_v47, -1e+30 }
 0x242   : > { %v1076_v49 = vpop.f32.mrf.mxu1  ;;  %v1159_v50 = vsel %vm1060_vm3, %v1149_v48, -inf }
 0x243   : > { %v1137_v51 = vmul.f32 0.35355338, %v1076_v49  ;;  %1160 = vmax.xlane.f32.xlu2 %v1159_v50 }
 0x245   : > { %v1146_v52 = vsel %vm1143_vm4, %v1137_v51, -1e+30 }
 0x246   : > { %v1095_v53 = vpop.f32.mrf.mxu2  ;;  %v1114_v54 = vpop.f32.mrf.mxu3  ;;  %v1150_v55 = vsel %vm1060_vm3, %v1146_v52, -inf }
 0x247   : > { %v1138_v56 = vmul.f32 0.35355338, %v1095_v53  ;;  %v1139_v57 = vmul.f32 0.35355338, %v1114_v54  ;;  %v1135_v58 = vpop.f32.mrf.mxu0  ;;  %1151 = vmax.xlane.f32.xlu1 %v1150_v55 }
 0x249   : > { %v1148_v59 = vsel %vm1143_vm4, %v1139_v57, -1e+30  ;;  %v1147_v60 = vsel %vm1143_vm4, %v1138_v56, -1e+30 }
 0x24a   : > { %v1078_v61 = vpop.f32.mrf.mxu1  ;;  %v1156_v62 = vsel %vm1060_vm3, %v1148_v59, -inf  ;;  %v1153_v63 = vsel %vm1060_vm3, %v1147_v60, -inf }
 0x24b   : > { %1157 = vmax.xlane.f32.xlu2 %v1156_v62  ;;  %1154 = vmax.xlane.f32.xlu0 %v1153_v63 }
 0x24e   : > { %v1097_v0 = vpop.f32.mrf.mxu2  ;;  %v1116_v1 = vpop.f32.mrf.mxu3 }
 0x25f   : > { %1944 = vrot.lane.b32.xlu0 %v2206_v13, %s2024_s30 }
 0x263   : > { %1939 = vrot.lane.b32.xlu2 %v2203_v10, %s2024_s30 }
 0x2b6   : > { %v1161_v2 = vpop.xlane.xlu2 %1160 }
 0x2b7   : > { %v1165_v4 = vsub.f32 %v1149_v48, %v1161_v2 }
 0x2b9   : > { %v1172_v5 = vmul.f32 1.442695, %v1165_v4 }
 0x2ba   : > { %v1152_v13 = vpop.xlane.xlu1 %1151 }
 0x2bb   : > { %1956 = vpow2.f32 %v1172_v5  ;;  %v1162_v10 = vsub.f32 %v1146_v52, %v1152_v13 }
 0x2bd   : > { %v1166_v19 = vmul.f32 1.442695, %v1162_v10 }
 0x2be   : > { %v1158_v6 = vpop.xlane.xlu2 %1157  ;;  %v1155_v7 = vpop.xlane.xlu0 %1154 }
 0x2bf   : > { %v1164_v8 = vsub.f32 %v1148_v59, %v1158_v6  ;;  %v1163_v12 = vsub.f32 %v1147_v60, %v1155_v7 }
 0x2c1   : > { %v2311_v9 = vpop.eup %1956  ;;  %v1170_v11 = vmul.f32 1.442695, %v1164_v8  ;;  %v1168_v15 = vmul.f32 1.442695, %v1163_v12 }
 0x2c2   : > { %v1183_v14 = vsel %vm1060_vm3, %v2311_v9, 0.0 }
 0x2c3   : > { %1958 = vpow2.f32 %v1170_v11  ;;  %1184 = vadd.xlane.f32.xlu0 %v1183_v14 }
 0x2c4   : > { %1960 = vpow2.f32 %v1168_v15 }
 0x2c5   : > { %1962 = vpow2.f32 %v1166_v19 }
 0x2c6   : > { %v1940_v17 = vpop.permute.xlu2 %1939 }
 0x2c7   : > { %v1942_v21 = vunpack.i.h.bf16 %v1940_v17  ;;  %v1941_v22 = vunpack.i.l.bf16 %v1940_v17 }
 0x2c9   : > { %v2315_v16 = vpop.eup %1958  ;;  %v956_v24 = vrot.slane %v1942_v21, 4  ;;  %v944_v26 = vrot.slane %v1941_v22, 4 }
 0x2ca   : > { %v1180_v18 = vsel %vm1060_vm3, %v2315_v16, 0.0  ;;  %v2319_v23 = vpop.eup %1960 }
 0x2cb   : > { %1181 = vadd.xlane.f32.xlu1 %v1180_v18  ;;  %v1177_v29 = vsel %vm1060_vm3, %v2319_v23, 0.0  ;;  %v2329_v39 = vpop.eup %1962 }
 0x2cc   : > { %v1174_v50 = vsel %vm1060_vm3, %v2329_v39, 0.0 }
 0x2d1   : > { %v1945_v25 = vpop.permute.xlu0 %1944 }
 0x2d2   : > { %v1947_v27 = vunpack.i.h.bf16 %v1945_v25  ;;  %v1946_v28 = vunpack.i.l.bf16 %v1945_v25 }
 0x2d3   : > { %1178 = vadd.xlane.f32.xlu1 %v1177_v29 }
 0x2d4   : > { %v954_v30 = vrot.slane %v1947_v27, 4  ;;  %v957_v31 = vsel %vm698_vm2, %v1947_v27, %v956_v24  ;;  %v942_v32 = vrot.slane %v1946_v28, 4  ;;  %v945_v33 = vsel %vm698_vm2, %v1946_v28, %v944_v26 }
 0x2d5   : > { %v965_v34 = vperm.slane %v957_v31, %v2211_v20  ;;  %v953_v36 = vperm.slane %v945_v33, %v2211_v20 }
 0x2d6   : > { %v955_v37 = vsel %vm698_vm2, %v954_v30, %v1942_v21  ;;  %v943_v38 = vsel %vm698_vm2, %v942_v32, %v1941_v22 }
 0x2d7   : > { %v961_v40 = vperm.slane %v955_v37, %v2211_v20  ;;  %v978_v41 = vrot.slane %v965_v34, 4  ;;  %v949_v42 = vperm.slane %v943_v38, %v2211_v20  ;;  %v980_v43 = vrot.slane %v953_v36, 4 }
 0x2d9   : > { %v966_v44 = vrot.slane %v961_v40, 4  ;;  %v968_v45 = vrot.slane %v949_v42, 4  ;;  %v979_v46 = vsel %vm698_vm2, %v978_v41, %v953_v36  ;;  %v981_v47 = vsel %vm698_vm2, %v965_v34, %v980_v43 }
 0x2da   : > { %v985_v48 = vperm.slane %v979_v46, %v2221_v35  ;;  %v989_v49 = vperm.slane %v981_v47, %v2221_v35 }
 0x2db   : > { %v967_v51 = vsel %vm698_vm2, %v966_v44, %v949_v42  ;;  %v969_v52 = vsel %vm698_vm2, %v961_v40, %v968_v45  ;;  %1175 = vadd.xlane.f32.xlu1 %v1174_v50 }
 0x2dc   : > { %v973_v53 = vperm.slane %v967_v51, %v2221_v35  ;;  %v977_v54 = vperm.slane %v969_v52, %v2221_v35  ;;  %v994_v55 = vrot.slane %v985_v48, 4  ;;  %v996_v56 = vrot.slane %v989_v49, 4 }
 0x2de   : > { %v990_v57 = vrot.slane %v973_v53, 4  ;;  %v992_v58 = vrot.slane %v977_v54, 4  ;;  %v997_v59 = vsel %vm698_vm2, 0.0, %v996_v56  ;;  %v1009_v60 = vsel %vm698_vm2, %v996_v56, %v985_v48 }
 0x2df   : > { %v1014_v61 = vrot.slane %v997_v59, 4  ;;  %v995_v63 = vsel %vm698_vm2, 0.0, %v994_v55  ;;  %v1013_v1 = vperm.slane %v1009_v60, %v2211_v20 }
 0x2e0   : > { %v993_v62 = vsel %vm698_vm2, 0.0, %v992_v58  ;;  %v998_v0 = vsel %vm698_vm2, %v992_v58, %v973_v53  ;;  %v991_v6 = vsel %vm698_vm2, 0.0, %v990_v57 }
 0x2e1   : > { %v1003_v2 = vrot.slane %v993_v62, 4  ;;  %v1002_v4 = vperm.slane %v998_v0, %v2211_v20  ;;  %v1015_v5 = vsel %vm698_vm2, %v1014_v61, %v995_v63  ;;  %v1034_v8 = vrot.slane %v1013_v1, 4 }
 0x2e2   : > { %v1019_v7 = vperm.slane %v1015_v5, %v2211_v20 }
 0x2e3   : > { %v1004_v11 = vsel %vm698_vm2, %v1003_v2, %v991_v6  ;;  %v1022_v12 = vrot.slane %v1002_v4, 4 }
 0x2e4   : > { %v1008_v14 = vperm.slane %v1004_v11, %v2211_v20  ;;  %v1035_v15 = vsel %vm698_vm2, %v1019_v7, %v1034_v8  ;;  %v1032_v13 = vrot.slane %v1019_v7, 4 }
 0x2e5   : > { %v1043_v10 = vperm.slane %v1035_v15, %v2221_v35 }
 0x2e6   : > { %v1023_v17 = vsel %vm698_vm2, %v1008_v14, %v1022_v12  ;;  %v1020_v18 = vrot.slane %v1008_v14, 4  ;;  %v1033_v19 = vsel %vm698_vm2, %v1032_v13, %v1013_v1 }
 0x2e7   : > { %v1031_v21 = vperm.slane %v1023_v17, %v2221_v35  ;;  %v1048_v22 = vrot.slane %v1043_v10, 4  ;;  %v1039_v24 = vperm.slane %v1033_v19, %v2221_v35 }
 0x2e8   : > { %v1021_v25 = vsel %vm698_vm2, %v1020_v18, %v1002_v4 }
 0x2e9   : > { %v1049_v26 = vsel %vm698_vm2, %v1048_v22, %v1031_v21  ;;  %v1050_v27 = vrot.slane %v1031_v21, 4  ;;  %v1027_v28 = vperm.slane %v1021_v25, %v2221_v35  ;;  %v1044_v29 = vrot.slane %v1039_v24, 4 }
 0x2ea   : > { %v1200_v30 = vpack.c.bf16 %v1049_v26, %v1049_v26 }
 0x2eb   : > { %v1045_v31 = vsel %vm698_vm2, %v1044_v29, %v1027_v28  ;;  %v1051_v32 = vsel %vm698_vm2, %v1043_v10, %v1050_v27  ;;  %v1046_v33 = vrot.slane %v1027_v28, 4 }
 0x2ec   : > { %v1245_v34 = vsel %vm1205_vm5, %v1200_v30, 0  ;;  %v1198_v36 = vpack.c.bf16 %v1045_v31, %v1045_v31  ;;  %v1201_v37 = vpack.c.bf16 %v1051_v32, %v1051_v32 }
 0x2ed   : > { %1254 = vmatpush.bf16.msrb.mxu3 %v1245_v34  ;;  %v1047_v38 = vsel %vm698_vm2, %v1039_v24, %v1046_v33 }
 0x2ee   : > { %v1207_v40 = vsel %vm1205_vm5, %v1198_v36, 0  ;;  %v1264_v41 = vsel %vm1205_vm5, %v1201_v37, 0  ;;  %v1199_v42 = vpack.c.bf16 %v1047_v38, %v1047_v38 }
 0x2ef   : > { %1216 = vmatpush.bf16.msrb.mxu1 %v1207_v40  ;;  %1273 = vmatpush.bf16.msra.mxu0 %v1264_v41 }
 0x2f0   : > { %v1226_v43 = vsel %vm1205_vm5, %v1199_v42, 0 }
 0x2f1   : > { %1235 = vmatpush.bf16.msrb.mxu2 %v1226_v43 }
 0x336   : > { %v1185_v44 = vpop.xlane.xlu0 %1184 }
 0x337   : > { %1964 = vrcp.f32 %v1185_v44 }
 0x33d   : > { %v1965_v45 = vpop.eup %1964 }
 0x33e   : > { %v1193_v46 = vmul.f32 %v1965_v45, %v2311_v9  ;;  %v1182_v47 = vpop.xlane.xlu1 %1181 }
 0x33f   : > { %1966 = vrcp.f32 %v1182_v47 }
 0x340   : > { %v1197_v48 = vpack.c.bf16 %v1193_v46, %v1193_v46 }
 0x342   : > { %1825 = vmatmul.msk.bf16.vlgmr.msra.gmra.mxu0 %vm1060_vm3, %v1197_v48 }
 0x345   : > { %v1967_v49 = vpop.eup %1966 }
 0x346   : > { %v1192_v50 = vmul.f32 %v1967_v49, %v2315_v16  ;;  %v1179_v51 = vpop.xlane.xlu1 %1178 }
 0x347   : > { %1968 = vrcp.f32 %v1179_v51 }
 0x348   : > { %v1196_v52 = vpack.c.bf16 %v1192_v50, %v1192_v50 }
 0x34a   : > { %1824 = vmatmul.msk.bf16.vlgmr.msrb.gmra.mxu3 %vm1060_vm3, %v1196_v52 }
 0x34d   : > { %v1969_v53 = vpop.eup %1968 }
 0x34e   : > { %v1191_v54 = vmul.f32 %v1969_v53, %v2319_v23  ;;  %v1176_v55 = vpop.xlane.xlu1 %1175 }
 0x34f   : > { %1970 = vrcp.f32 %v1176_v55 }
 0x350   : > { %v1195_v56 = vpack.c.bf16 %v1191_v54, %v1191_v54 }
 0x352   : > { %1823 = vmatmul.msk.bf16.vlgmr.msrb.gmra.mxu2 %vm1060_vm3, %v1195_v56 }
 0x355   : > { %v1971_v9 = vpop.eup %1970 }
 0x356   : > { %v1190_v57 = vmul.f32 %v1971_v9, %v2329_v39 }
 0x358   : > { %v1194_v58 = vpack.c.bf16 %v1190_v57, %v1190_v57 }
 0x35a   : > { %1822 = vmatmul.msk.bf16.vlgmr.msrb.gmra.mxu1 %vm1060_vm3, %v1194_v58 }
 0x3bf   : > { %v1275_v16 = vpop.f32.mrf.mxu0 }
 0x3c0   : > { %v1291_v61 = vrot.slane %v1275_v16, 4 }
 0x3c7   : > { %v1277_v59 = vpop.f32.mrf.mxu0 }
 0x3cd   : > { %v1256_v60 = vpop.f32.mrf.mxu3 }
 0x3ce   : > { %v1279_v0 = vrot.slane %v1256_v60, 4 }
 0x3d5   : > { %v1237_v62 = vpop.f32.mrf.mxu2  ;;  %v1258_v63 = vpop.f32.mrf.mxu3 }
 0x3d6   : > { %v1292_v23 = vsel %vm698_vm2, %v1291_v61, %v1237_v62  ;;  %v1293_v1 = vrot.slane %v1237_v62, 4 }
 0x3d7   : > { %v1298_v2 = vperm.slane %v1292_v23, %v2211_v20  ;;  %v1218_v4 = vpop.f32.mrf.mxu1 }
 0x3d8   : > { %v1294_v5 = vsel %vm698_vm2, %v1275_v16, %v1293_v1  ;;  %v1280_v39 = vsel %vm698_vm2, %v1279_v0, %v1218_v4  ;;  %v1281_v6 = vrot.slane %v1218_v4, 4  ;;  %v1869_v1 = vld [vmem:[%s2149_s29] sm:$0xff] }
 0x3d9   : > { %v1302_v7 = vperm.slane %v1294_v5, %v2211_v20  ;;  %v1303_v8 = vrot.slane %v1298_v2, 4  ;;  %v1286_v11 = vperm.slane %v1280_v39, %v2211_v20 }
 0x3da   : > { %v1282_v12 = vsel %vm698_vm2, %v1256_v60, %v1281_v6 }
 0x3db   : > { %v1315_v14 = vrot.slane %v1302_v7, 4  ;;  %v1290_v15 = vperm.slane %v1282_v12, %v2211_v20  ;;  %v1304_v13 = vsel %vm698_vm2, %v1303_v8, %v1286_v11  ;;  %v1305_v10 = vrot.slane %v1286_v11, 4  ;;  %v1949_v11 = vld [vmem:[%s2528_s12] ss:$0 sm:$0xff] }
 0x3dc   : > { %v1310_v17 = vperm.slane %v1304_v13, %v2221_v35 }
 0x3dd   : > { %v1306_v18 = vsel %vm698_vm2, %v1298_v2, %v1305_v10  ;;  %v1316_v19 = vsel %vm698_vm2, %v1315_v14, %v1290_v15  ;;  %v1317_v21 = vrot.slane %v1290_v15, 4  ;;  %v1239_v22 = vpop.f32.mrf.mxu2 }
 0x3de   : > { %v1314_v24 = vperm.slane %v1306_v18, %v2221_v35  ;;  %v1322_v25 = vperm.slane %v1316_v19, %v2221_v35  ;;  %v1327_v29 = vrot.slane %v1310_v17, 4 }
 0x3df   : > { %v1318_v26 = vsel %vm698_vm2, %v1302_v7, %v1317_v21  ;;  %v1220_v27 = vpop.f32.mrf.mxu1 }
 0x3e0   : > { %v1326_v28 = vperm.slane %v1318_v26, %v2221_v35  ;;  %v1329_v30 = vrot.slane %v1314_v24, 4  ;;  %v1331_v32 = vrot.slane %v1322_v25, 4  ;;  %v1328_v38 = vsel %vm698_vm2, 0.0, %v1327_v29 }
 0x3e2   : > { %v1330_v31 = vsel %vm698_vm2, 0.0, %v1329_v30  ;;  %v1333_v33 = vrot.slane %v1326_v28, 4  ;;  %v1335_v34 = vsel %vm698_vm2, %v1329_v30, %v1310_v17  ;;  %v1332_v45 = vsel %vm698_vm2, 0.0, %v1331_v32  ;;  %v1872_v30 = vld [vmem:[%s2166_s24 + $0x8] sm:$0xff]  ;;  %v1876_v32 = vld [vmem:[%s2180_s0 + $0x18] sm:$0xff] }
 0x3e3   : > { %v1340_v36 = vrot.slane %v1330_v31, 4  ;;  %v1339_v37 = vperm.slane %v1335_v34, %v2211_v20  ;;  %v2028_v17 = vmov 32.0   ;;  %1513 = vmatpush.bf16.msra.mxu2 %v1872_v30  ;;  %v1871_v31 = vld [vmem:[%s2166_s24] sm:$0xff]  ;;  %1566 = vmatpush.bf16.msra.mxu3 %v1876_v32 }
 0x3e4   : > { %v1334_v40 = vsel %vm698_vm2, 0.0, %v1333_v33  ;;  %v1346_v41 = vsel %vm698_vm2, %v1333_v33, %v1322_v25  ;;  %1972 = vrcp.f32 %v2028_v17 }
 0x3e5   : > { %v1351_v42 = vrot.slane %v1334_v40, 4  ;;  %v1341_v43 = vsel %vm698_vm2, %v1340_v36, %v1328_v38  ;;  %v1350_v44 = vperm.slane %v1346_v41, %v2211_v20  ;;  %v1359_v47 = vrot.slane %v1339_v37, 4  ;;  %v1875_v36 = vld [vmem:[%s2180_s0 + $0x10] sm:$0xff] }
 0x3e6   : > { %v1345_v46 = vperm.slane %v1341_v43, %v2211_v20 }
 0x3e7   : > { %v1352_v48 = vsel %vm698_vm2, %v1351_v42, %v1332_v45  ;;  %v1371_v49 = vrot.slane %v1350_v44, 4  ;;  %1514 = vmatpush.bf16.msra.mxu2 %v1871_v31  ;;  %1567 = vmatpush.bf16.msra.mxu3 %v1875_v36  ;;  %v1950_v45 = vld [vmem:[%s2529_s21] ss:$0 sm:$0xff] }
 0x3e8   : > { %v1356_v50 = vperm.slane %v1352_v48, %v2211_v20  ;;  %v1357_v51 = vrot.slane %v1345_v46, 4  ;;  %v1360_v52 = vsel %vm698_vm2, %v1345_v46, %v1359_v47  ;;  %v1951_v47 = vld [vmem:[%s2530_s27] ss:$0 sm:$0xff] }
 0x3e9   : > { %v1368_v58 = vperm.slane %v1360_v52, %v2221_v35  ;;  %v1874_v52 = vld [vmem:[%s2180_s0 + $0x8] sm:$0xff] }
 0x3ea   : > { %v1372_v53 = vsel %vm698_vm2, %v1356_v50, %v1371_v49  ;;  %v1358_v54 = vsel %vm698_vm2, %v1357_v51, %v1339_v37  ;;  %v1369_v55 = vrot.slane %v1356_v50, 4  ;;  %v1973_v18 = vpop.eup %1972 }
 0x3eb   : > { %v1380_v56 = vperm.slane %v1372_v53, %v2221_v35  ;;  %v1364_v9 = vperm.slane %v1358_v54, %v2221_v35  ;;  %v1387_v0 = vrot.slane %v1368_v58, 4  ;;  %v1450_v19 = vmul.f32 32.0, %v1973_v18  ;;  %1568 = vmatpush.bf16.msra.mxu3 %v1874_v52  ;;  %v1873_v53 = vld [vmem:[%s2180_s0] sm:$0xff] }
 0x3ec   : > { %v1370_v57 = vsel %vm698_vm2, %v1369_v55, %v1350_v44  ;;  %vm1454_vm8 = vweird.f32 %v1973_v18  ;;  %v1952_v54 = vld [vmem:[%s2532_s3] ss:$0 sm:$0xff] }
 0x3ed   : > { %v1385_v16 = vrot.slane %v1380_v56, 4  ;;  %v1376_v20 = vperm.slane %v1370_v57, %v2221_v35  ;;  %v1383_v59 = vrot.slane %v1364_v9, 4  ;;  %v1388_v23 = vsel %vm698_vm2, %v1380_v56, %v1387_v0  ;;  %v1870_v35 = vld [vmem:[%s2149_s29 + $0x8] sm:$0xff] }
 0x3ee   : > { %1436 = vmatpush.bf16.msra.mxu1 %v1870_v35  ;;  %v1451_v21 = vsub.f32 1.0, %v1450_v19 }
 0x3ef   : > { %v1386_v60 = vsel %vm698_vm2, %v1385_v16, %v1368_v58  ;;  %v1381_v61 = vrot.slane %v1376_v20, 4  ;;  %v1384_v62 = vsel %vm698_vm2, %v1376_v20, %v1383_v59  ;;  %1569 = vmatpush.bf16.msra.mxu3 %v1873_v53  ;;  %v1953_v16 = vld [vmem:[%s629_s13] ss:$0 sm:$0xff] }
 0x3f0   : > { %1394 = vrot.lane.b32.xlu1 %v1386_v60, %s2025_s23  ;;  %1390 = vrot.lane.b32.xlu2 %v1384_v62, %s2026_s22  ;;  %v1452_v22 = vmul.f32 %v1973_v18, %v1451_v21 }
 0x3f1   : > { %v1382_v63 = vsel %vm698_vm2, %v1381_v61, %v1364_v9 }
 0x3f2   : > { %1437 = vmatpush.bf16.msra.mxu1 %v1869_v1  ;;  %v1453_v24 = vadd.f32 %v1973_v18, %v1452_v22 }
 0x3f4   : > { %v1455_v25 = vsel %vm1454_vm8, %v1973_v18, %v1453_v24 }
 0x3f8   : > { %1398 = vrot.lane.b32.xlu2 %v1388_v23, %s2027_s26 }
 0x44a   : > { %v1391_v2 = vpop.permute.xlu2 %1390 }
 0x44b   : > { %v1401_v4 = vsel %vm1060_vm3, %v1382_v63, %v1391_v2 }
 0x452   : > { %v1399_v39 = vpop.permute.xlu2 %1398 }
 0x462   : > { %v1395_v5 = vpop.permute.xlu1 %1394 }
 0x463   : > { %v1403_v6 = vsel %vm1402_vm6, %v1401_v4, %v1395_v5 }
 0x464   : > { %v1405_v7 = vsel %vm1404_vm7, %v1403_v6, %v1399_v39 }
 0x465   : > { %v1406_v8 = vpack.c.bf16 %v1405_v7, %v1405_v7 }
 0x467   : > { %1834 = vmatmul.msk.bf16.vlgmr.msra.gmra.mxu1 %vm670_vm1, %v1406_v8 }
 0x4e4   : > { %v1439_v12 = vpop.f32.mrf.mxu1 }
 0x4e5   : > { %v1440_v14 = vadd.f32 %v1949_v11, %v1439_v12 }
 0x4e7   : > { %v1443_v15 = vadd.f32 %v1440_v14, %v2198_v3  ;;  %v1954_v14 = vld [vmem:[%s632_s1] ss:$0 sm:$0xff] }
 0x4e9   : > { %v1446_v13 = vsel %vm670_vm1, %v1443_v15, 0.0 }
 0x4ea   : > { %1447 = vadd.xlane.f32.xlu2 %v1446_v13  ;;  %v1955_v13 = vld [vmem:[%s635_s7] ss:$0 sm:$0xff] }
 0x4ec   : > { %v1441_v10 = vpop.f32.mrf.mxu1 }
 0x55d   : > { %v1448_v26 = vpop.xlane.xlu2 %1447 }
 0x55e   : > { %v1456_v27 = vmul.f32 %v1455_v25, %v1448_v26 }
 0x560   : > { %v1457_v3 = vsub.f32 %v1443_v15, %v1456_v27 }
 0x562   : > { %v1458_v28 = vmul.f32 %v1457_v3, %v1457_v3 }
 0x564   : > { %v1459_v29 = vsel %vm670_vm1, %v1458_v28, 0.0 }
 0x565   : > { %1460 = vadd.xlane.f32.xlu1 %v1459_v29 }
 0x5d8   : > { %v1461_v33 = vpop.xlane.xlu1 %1460 }
 0x5d9   : > { %v1462_v34 = vmul.f32 %v1461_v33, %v1455_v25 }
 0x5db   : > { %v1463_v37 = vadd.f32 1e-05, %v1462_v34 }
 0x5dd   : > { %1974 = vrsqrt.f32 %v1463_v37  ;;  %vm1470_vm10 = vweird.f32 %v1463_v37 }
 0x5e3   : > { %v1975_v38 = vpop.eup %1974 }
 0x5e4   : > { %v1465_v40 = vmul.f32 %v1975_v38, %v1463_v37  ;;  %vm1471_vm9 = vweird.f32 %v1975_v38 }
 0x5e5   : > { %vm1472_vm11 = vmor %vm1470_vm10, %vm1471_vm9 }
 0x5e6   : > { %v1466_v41 = vmul.f32 %v1975_v38, %v1465_v40 }
 0x5e8   : > { %v1467_v42 = vmul.f32 0.5, %v1466_v41 }
 0x5ea   : > { %v1468_v43 = vsub.f32 1.5, %v1467_v42 }
 0x5ec   : > { %v1469_v44 = vmul.f32 %v1975_v38, %v1468_v43 }
 0x5ee   : > { %v1473_v46 = vsel %vm1472_vm11, %v1975_v38, %v1469_v44 }
 0x5ef   : > { %v1474_v48 = vmul.f32 %v1473_v46, %v1457_v3 }
 0x5f1   : > { %v1478_v49 = vmul.f32 %v1950_v45, %v1474_v48 }
 0x5f3   : > { %v1482_v50 = vadd.f32 %v1951_v47, %v1478_v49 }
 0x5f5   : > { %v1483_v51 = vpack.c.bf16 %v1482_v50, %v1482_v50 }
 0x5f7   : > { %1843 = vmatmul.msk.bf16.vlgmr.msra.gmra.mxu2 %vm670_vm1, %v1483_v51 }
 0x67a   : > { %v1516_v55 = vpop.f32.mrf.mxu2 }
 0x67b   : > { %v1517_v56 = vadd.f32 %v1952_v54, %v1516_v55 }
 0x67d   : > { %v1520_v9 = vmax.f32 %v1517_v56, 0.0 }
 0x67f   : > { %v1521_v57 = vpack.c.bf16 %v1520_v9, %v1520_v9 }
 0x681   : > { %1860 = vmatmul.msk.bf16.vlgmr.msra.gmra.mxu3 %vm1558_vm12, %v1521_v57 }
 0x682   : > { %v1518_v58 = vpop.f32.mrf.mxu2 }
 0x704   : > { %v1571_v20 = vpop.f32.mrf.mxu3 }
 0x705   : > { %v1572_v59 = vadd.f32 %v1953_v16, %v1571_v20 }
 0x707   : > { %v1575_v60 = vadd.f32 %v1572_v59, %v1482_v50 }
 0x709   : > { %v1578_v61 = vsel %vm670_vm1, %v1575_v60, 0.0 }
 0x70a   : > { %1579 = vadd.xlane.f32.xlu0 %v1578_v61 }
 0x70c   : > { %v1573_v62 = vpop.f32.mrf.mxu3 }
 0x77d   : > { %v1580_v63 = vpop.xlane.xlu0 %1579 }
 0x77e   : > { %v1581_v0 = vmul.f32 %v1580_v63, %v1455_v25 }
 0x780   : > { %v1582_v23 = vsub.f32 %v1575_v60, %v1581_v0 }
 0x782   : > { %v1583_v35 = vmul.f32 %v1582_v23, %v1582_v23 }
 0x784   : > { %v1584_v1 = vsel %vm670_vm1, %v1583_v35, 0.0 }
 0x785   : > { %1585 = vadd.xlane.f32.xlu0 %v1584_v1 }
 0x7f8   : > { %v1586_v2 = vpop.xlane.xlu0 %1585 }
 0x7f9   : > { %v1587_v4 = vmul.f32 %v1586_v2, %v1455_v25 }
 0x7fb   : > { %v1588_v5 = vadd.f32 1e-05, %v1587_v4 }
 0x7fd   : > { %1976 = vrsqrt.f32 %v1588_v5  ;;  %vm1595_vm14 = vweird.f32 %v1588_v5 }
 0x803   : > { %v1977_v39 = vpop.eup %1976 }
 0x804   : > { %v1590_v6 = vmul.f32 %v1977_v39, %v1588_v5  ;;  %vm1596_vm13 = vweird.f32 %v1977_v39 }
 0x805   : > { %vm1597_vm15 = vmor %vm1595_vm14, %vm1596_vm13 }
 0x806   : > { %v1591_v7 = vmul.f32 %v1977_v39, %v1590_v6 }
 0x808   : > { %v1592_v8 = vmul.f32 0.5, %v1591_v7 }
 0x80a   : > { %v1593_v11 = vsub.f32 1.5, %v1592_v8 }
 0x80c   : > { %v1594_v12 = vmul.f32 %v1977_v39, %v1593_v11 }
 0x80e   : > { %v1598_v15 = vsel %vm1597_vm15, %v1977_v39, %v1594_v12 }
 0x80f   : > { %v1599_v10 = vmul.f32 %v1598_v15, %v1582_v23 }
 0x811   : > { %v1603_v17 = vmul.f32 %v1954_v14, %v1599_v10 }
 0x813   : > { %v1607_v18 = vadd.f32 %v1955_v13, %v1603_v17 }
 0x815   : > { %1608 = vst.msk [vmem:[%s2193_s8] sm:$0xff] %vm670_vm1, %v1607_v18 }
 0x816 PF: > { %s2534_s26 = sld [smem:[#allocation5_spill]] }
 0x817   : > { %s2535_s25 = sld [smem:[#allocation3_spill]] }
 0x818   : > { %s2537_s27 = sld [smem:[#allocation6_spill]] }
 0x819   : > { %s2538_s28 = sld [smem:[#allocation7_spill]] }
 0x81c   : > { %s23_s29 = sadd.s32 1, %s2534_s26   ;;  %s2536_s26 = sld [smem:[#allocation4_spill]] }
 0x81d   : > { %p20_p8 = scmp.ge.s32.totalorder %s23_s29, 6  }
 0x81f   :  { %22 = sbr.rel (!%p20_p8) target bundleno = 9 (0x9), region = 142 }

</bundles_post_ra>
